<compile_context>
chip_gen: v7x
topology: tpu7x:2x2x1
jax: 0.10.0
libtpu: 0.0.40
codegen_flags: <defaults>
</compile_context>

<pallas_src>
import functools

import jax
import jax.numpy as jnp
from jax.experimental import pallas as pl
from jax.experimental.pallas import tpu as pltpu

MNIST_INPUT_SIZE = 784
HIDDEN_LAYER_SIZE_1 = 512
HIDDEN_LAYER_SIZE_2 = 256
DEFAULT_LATENT_DIM = 2

OUT_WIDTH = 128  # lane-padded width of the fused head and of the kernel output slab


def _vae_encoder_kernel(x_ref, w1_ref, b1_ref, w2_ref, b2_ref, w34_ref, b34_ref,
                        eps_ref, o_ref, *, latent):
    # linear1 + relu (bf16 operands, f32 accumulation on the MXU)
    x16 = x_ref[...].astype(jnp.bfloat16)
    h1 = jnp.dot(x16, w1_ref[...], preferred_element_type=jnp.float32) + b1_ref[...]
    h1 = jnp.maximum(h1, 0.0).astype(jnp.bfloat16)

    # linear2 + relu
    h2 = jnp.dot(h1, w2_ref[...], preferred_element_type=jnp.float32) + b2_ref[...]
    h2 = jnp.maximum(h2, 0.0).astype(jnp.bfloat16)

    # fused latent heads: lanes [0:L) = mu, lanes [L:2L) = linear4 pre-activation, rest 0
    head = jnp.dot(h2, w34_ref[...], preferred_element_type=jnp.float32) + b34_ref[...]
    mu = head[:, :latent]
    pre4 = head[:, latent:2 * latent]

    sigma = jnp.exp(pre4)          # the single transcendental
    var = sigma * sigma            # == exp(log_var)
    log_var = 2.0 * pre4           # == log(sigma**2), computed without log()

    # reparameterization: z = mu + sigma * N(0,1)
    z = mu + sigma * eps_ref[...]

    # per-row KL term: -0.5 * sum_d(1 + log_var - mu^2 - exp(log_var))
    kl_row = -0.5 * jnp.sum(1.0 + log_var - mu * mu - var, axis=1, keepdims=True)

    # lane-padded output slab: [ z | kl_row | zeros ]
    o_ref[...] = jnp.zeros_like(o_ref)
    o_ref[:, :latent] = z
    o_ref[:, latent:latent + 1] = kl_row


def pack_params(params, latent=DEFAULT_LATENT_DIM):
    """Cast matmul weights to bf16 and fuse/pad the two latent heads to OUT_WIDTH lanes."""
    w34 = jnp.zeros((HIDDEN_LAYER_SIZE_2, OUT_WIDTH), jnp.float32)
    w34 = w34.at[:, :latent].set(params["w3"])
    w34 = w34.at[:, latent:2 * latent].set(params["w4"])
    b34 = jnp.zeros((1, OUT_WIDTH), jnp.float32)
    b34 = b34.at[:, :latent].set(params["b3"])
    b34 = b34.at[:, latent:2 * latent].set(params["b4"])
    return dict(
        w1=params["w1"].astype(jnp.bfloat16), b1=params["b1"],
        w2=params["w2"].astype(jnp.bfloat16), b2=params["b2"],
        w34=w34.astype(jnp.bfloat16), b34=b34,
    )


def variational_encoder_forward(x, packed, eps, latent=DEFAULT_LATENT_DIM):
    """x: (B, 784) f32, eps: (B, latent) f32. Returns (z: (B, latent), kl: scalar)."""
    B = x.shape[0]
    tile_b = min(B, 256)
    grid = (pl.cdiv(B, tile_b),)

    kernel = functools.partial(_vae_encoder_kernel, latent=latent)

    def const_spec(shape):  # full-array block, same tile every grid step (stays VMEM-resident)
        return pl.BlockSpec(shape, lambda i: (0,) * len(shape))

    out = pl.pallas_call(
        kernel,
        out_shape=jax.ShapeDtypeStruct((B, OUT_WIDTH), jnp.float32),
        grid=grid,
        in_specs=[
            pl.BlockSpec((tile_b, MNIST_INPUT_SIZE), lambda i: (i, 0)),   # x tile
            const_spec(packed["w1"].shape), const_spec(packed["b1"].shape),
            const_spec(packed["w2"].shape), const_spec(packed["b2"].shape),
            const_spec(packed["w34"].shape), const_spec(packed["b34"].shape),
            pl.BlockSpec((tile_b, latent), lambda i: (i, 0)),             # eps tile
        ],
        out_specs=pl.BlockSpec((tile_b, OUT_WIDTH), lambda i: (i, 0)),
        compiler_params=pltpu.CompilerParams(dimension_semantics=("parallel",)),
    )(x, packed["w1"], packed["b1"], packed["w2"], packed["b2"],
      packed["w34"], packed["b34"], eps)

    z = out[:, :latent]
    kl = jnp.mean(out[:, latent])
    return z, kl


def init_params(key, latent_dims=DEFAULT_LATENT_DIM):
    """Synthetic params matching nn.Linear. W stored transposed as (in, out), b as (1, out)."""
    ks = jax.random.split(key, 8)

    def lin(kw, kb, fan_in, fan_out):
        bound = 1.0 / jnp.sqrt(fan_in)
        w = jax.random.uniform(kw, (fan_in, fan_out), jnp.float32, -bound, bound)
        b = jax.random.uniform(kb, (1, fan_out), jnp.float32, -bound, bound)
        return w, b

    w1, b1 = lin(ks[0], ks[1], MNIST_INPUT_SIZE, HIDDEN_LAYER_SIZE_1)
    w2, b2 = lin(ks[2], ks[3], HIDDEN_LAYER_SIZE_1, HIDDEN_LAYER_SIZE_2)
    w3, b3 = lin(ks[4], ks[5], HIDDEN_LAYER_SIZE_2, latent_dims)
    w4, b4 = lin(ks[6], ks[7], HIDDEN_LAYER_SIZE_2, latent_dims)
    return dict(w1=w1, b1=b1, w2=w2, b2=b2, w3=w3, b3=b3, w4=w4, b4=b4)


def reference_forward(x, packed, eps, latent=DEFAULT_LATENT_DIM):
    """Pure-JAX reference using the same packed bf16 weights / stable KL formulation."""
    h1 = jnp.maximum(
        jnp.dot(x.astype(jnp.bfloat16), packed["w1"],
                preferred_element_type=jnp.float32) + packed["b1"], 0.0)
    h2 = jnp.maximum(
        jnp.dot(h1.astype(jnp.bfloat16), packed["w2"],
                preferred_element_type=jnp.float32) + packed["b2"], 0.0)
    head = (jnp.dot(h2.astype(jnp.bfloat16), packed["w34"],
                    preferred_element_type=jnp.float32) + packed["b34"])
    mu = head[:, :latent]
    pre4 = head[:, latent:2 * latent]
    sigma = jnp.exp(pre4)
    z = mu + sigma * eps
    kl = jnp.mean(-0.5 * jnp.sum(1.0 + 2.0 * pre4 - mu * mu - sigma * sigma, axis=1))
    return z, kl


if __name__ == "__main__":
    key = jax.random.PRNGKey(0)
    k_params, k_x, k_eps = jax.random.split(key, 3)

    B = 8
    latent = DEFAULT_LATENT_DIM

    params = init_params(k_params, latent)
    packed = pack_params(params, latent)
    x = jax.random.uniform(k_x, (B, MNIST_INPUT_SIZE), jnp.float32)  # MNIST-like in [0,1)
    # TODO(synk): the torch module samples N(0,1) internally via torch.distributions;
    # noise is passed in explicitly here so the kernel is deterministic and testable.
    eps = jax.random.normal(k_eps, (B, latent), jnp.float32)

    z, kl = variational_encoder_forward(x, packed, eps, latent)
    z = jax.block_until_ready(z)
    kl = jax.block_until_ready(kl)

    z_ref, kl_ref = reference_forward(x, packed, eps, latent)
    assert jnp.allclose(z, z_ref, atol=1e-3, rtol=1e-3), "z mismatch"
    assert jnp.allclose(kl, kl_ref, atol=1e-3, rtol=1e-3), "kl mismatch"

    print("KERNEL_OK")
</pallas_src>

<mosaic_0001>
module attributes {stable_mosaic.version = 11 : i64} {
  func.func @_vae_encoder_kernel(%arg0: i32, %arg1: memref<8x784xf32, #tpu.memory_space<vmem>>, %arg2: memref<784x512xbf16, #tpu.memory_space<vmem>>, %arg3: memref<1x512xf32, #tpu.memory_space<vmem>>, %arg4: memref<512x256xbf16, #tpu.memory_space<vmem>>, %arg5: memref<1x256xf32, #tpu.memory_space<vmem>>, %arg6: memref<256x128xbf16, #tpu.memory_space<vmem>>, %arg7: memref<1x128xf32, #tpu.memory_space<vmem>>, %arg8: memref<8x2xf32, #tpu.memory_space<vmem>>, %arg9: memref<8x128xf32, #tpu.memory_space<vmem>>) attributes {dimension_semantics = [#tpu.dimension_semantics<parallel>], iteration_bounds = array<i64: 1>, scalar_prefetch = 0 : i64, scratch_operands = 0 : i64, tpu.core_type = #tpu.core_type<tc>, window_params = [{transform_indices = @transform_0, window_bounds = array<i64: 8, 784>}, {pipeline_mode = #tpu.pipeline_mode<synchronous>, transform_indices = @transform_1, window_bounds = array<i64: 784, 512>}, {pipeline_mode = #tpu.pipeline_mode<synchronous>, transform_indices = @transform_2, window_bounds = array<i64: 1, 512>}, {pipeline_mode = #tpu.pipeline_mode<synchronous>, transform_indices = @transform_3, window_bounds = array<i64: 512, 256>}, {pipeline_mode = #tpu.pipeline_mode<synchronous>, transform_indices = @transform_4, window_bounds = array<i64: 1, 256>}, {pipeline_mode = #tpu.pipeline_mode<synchronous>, transform_indices = @transform_5, window_bounds = array<i64: 256, 128>}, {pipeline_mode = #tpu.pipeline_mode<synchronous>, transform_indices = @transform_6, window_bounds = array<i64: 1, 128>}, {transform_indices = @transform_7, window_bounds = array<i64: 8, 2>}, {transform_indices = @transform_8, window_bounds = array<i64: 8, 128>}]} {
    %c0 = arith.constant 0 : index
    %c0_0 = arith.constant 0 : index
    %0 = vector.load %arg1[%c0, %c0_0] : memref<8x784xf32, #tpu.memory_space<vmem>>, vector<8x784xf32>
    %1 = arith.truncf %0 : vector<8x784xf32> to vector<8x784xbf16>
    %c0_1 = arith.constant 0 : index
    %c0_2 = arith.constant 0 : index
    %2 = vector.load %arg2[%c0_1, %c0_2] : memref<784x512xbf16, #tpu.memory_space<vmem>>, vector<784x512xbf16>
    %cst = arith.constant dense<0.000000e+00> : vector<8x512xf32>
    %3 = tpu.matmul %1, %2, %cst {dimension_numbers = #tpu.dot_dimension_numbers<[1], [0], [0], [1], [0, 0, 1, 1], [], []>} : vector<8x784xbf16>, vector<784x512xbf16>, vector<8x512xf32> -> vector<8x512xf32>
    %c0_3 = arith.constant 0 : index
    %c0_4 = arith.constant 0 : index
    %4 = vector.load %arg3[%c0_3, %c0_4] : memref<1x512xf32, #tpu.memory_space<vmem>>, vector<1x512xf32>
    %5 = vector.broadcast %4 : vector<1x512xf32> to vector<8x512xf32>
    %6 = arith.addf %3, %5 : vector<8x512xf32>
    %cst_5 = arith.constant 0.000000e+00 : f32
    %7 = vector.broadcast %cst_5 : f32 to vector<8x512xf32>
    %8 = arith.maximumf %6, %7 : vector<8x512xf32>
    %9 = arith.truncf %8 : vector<8x512xf32> to vector<8x512xbf16>
    %c0_6 = arith.constant 0 : index
    %c0_7 = arith.constant 0 : index
    %10 = vector.load %arg4[%c0_6, %c0_7] : memref<512x256xbf16, #tpu.memory_space<vmem>>, vector<512x256xbf16>
    %cst_8 = arith.constant dense<0.000000e+00> : vector<8x256xf32>
    %11 = tpu.matmul %9, %10, %cst_8 {dimension_numbers = #tpu.dot_dimension_numbers<[1], [0], [0], [1], [0, 0, 1, 1], [], []>} : vector<8x512xbf16>, vector<512x256xbf16>, vector<8x256xf32> -> vector<8x256xf32>
    %c0_9 = arith.constant 0 : index
    %c0_10 = arith.constant 0 : index
    %12 = vector.load %arg5[%c0_9, %c0_10] : memref<1x256xf32, #tpu.memory_space<vmem>>, vector<1x256xf32>
    %13 = vector.broadcast %12 : vector<1x256xf32> to vector<8x256xf32>
    %14 = arith.addf %11, %13 : vector<8x256xf32>
    %cst_11 = arith.constant 0.000000e+00 : f32
    %15 = vector.broadcast %cst_11 : f32 to vector<8x256xf32>
    %16 = arith.maximumf %14, %15 : vector<8x256xf32>
    %17 = arith.truncf %16 : vector<8x256xf32> to vector<8x256xbf16>
    %c0_12 = arith.constant 0 : index
    %c0_13 = arith.constant 0 : index
    %18 = vector.load %arg6[%c0_12, %c0_13] : memref<256x128xbf16, #tpu.memory_space<vmem>>, vector<256x128xbf16>
    %cst_14 = arith.constant dense<0.000000e+00> : vector<8x128xf32>
    %19 = tpu.matmul %17, %18, %cst_14 {dimension_numbers = #tpu.dot_dimension_numbers<[1], [0], [0], [1], [0, 0, 1, 1], [], []>} : vector<8x256xbf16>, vector<256x128xbf16>, vector<8x128xf32> -> vector<8x128xf32>
    %c0_15 = arith.constant 0 : index
    %c0_16 = arith.constant 0 : index
    %20 = vector.load %arg7[%c0_15, %c0_16] : memref<1x128xf32, #tpu.memory_space<vmem>>, vector<1x128xf32>
    %21 = vector.broadcast %20 : vector<1x128xf32> to vector<8x128xf32>
    %22 = arith.addf %19, %21 : vector<8x128xf32>
    %23 = vector.extract_strided_slice %22 {offsets = [0, 0], sizes = [8, 2], strides = [1, 1]} : vector<8x128xf32> to vector<8x2xf32>
    %24 = vector.extract_strided_slice %22 {offsets = [0, 2], sizes = [8, 2], strides = [1, 1]} : vector<8x128xf32> to vector<8x2xf32>
    %25 = math.exp %24 : vector<8x2xf32>
    %26 = arith.mulf %25, %25 : vector<8x2xf32>
    %cst_17 = arith.constant 2.000000e+00 : f32
    %27 = vector.broadcast %cst_17 : f32 to vector<8x2xf32>
    %28 = arith.mulf %27, %24 : vector<8x2xf32>
    %c0_18 = arith.constant 0 : index
    %c0_19 = arith.constant 0 : index
    %29 = vector.load %arg8[%c0_18, %c0_19] : memref<8x2xf32, #tpu.memory_space<vmem>>, vector<8x2xf32>
    %30 = arith.mulf %25, %29 : vector<8x2xf32>
    %31 = arith.addf %23, %30 : vector<8x2xf32>
    %cst_20 = arith.constant 1.000000e+00 : f32
    %32 = vector.broadcast %cst_20 : f32 to vector<8x2xf32>
    %33 = arith.addf %32, %28 : vector<8x2xf32>
    %34 = arith.mulf %23, %23 : vector<8x2xf32>
    %35 = arith.subf %33, %34 : vector<8x2xf32>
    %36 = arith.subf %35, %26 : vector<8x2xf32>
    %cst_21 = arith.constant dense<0.000000e+00> : vector<8xf32>
    %37 = vector.multi_reduction <add>, %36, %cst_21 [1] : vector<8x2xf32> to vector<8xf32>
    %38 = vector.shape_cast %37 : vector<8xf32> to vector<8x1xf32>
    %cst_22 = arith.constant -5.000000e-01 : f32
    %39 = vector.broadcast %cst_22 : f32 to vector<8x1xf32>
    %40 = arith.mulf %39, %38 : vector<8x1xf32>
    %cst_23 = arith.constant 0.000000e+00 : f32
    %41 = vector.broadcast %cst_23 : f32 to vector<8x128xf32>
    %c0_24 = arith.constant 0 : index
    %c0_25 = arith.constant 0 : index
    %42 = vector.load %arg9[%c0_24, %c0_25] : memref<8x128xf32, #tpu.memory_space<vmem>>, vector<8x128xf32>
    tpu.vector_store %arg9[%c0_24, %c0_25], %41 {strides = array<i32>} : memref<8x128xf32, #tpu.memory_space<vmem>>, vector<8x128xf32>,
    %c0_26 = arith.constant 0 : index
    %c0_27 = arith.constant 0 : index
    %43 = vector.load %arg9[%c0_26, %c0_27] : memref<8x128xf32, #tpu.memory_space<vmem>>, vector<8x2xf32>
    tpu.vector_store %arg9[%c0_26, %c0_27], %31 {strides = array<i32>} : memref<8x128xf32, #tpu.memory_space<vmem>>, vector<8x2xf32>,
    %c0_28 = arith.constant 0 : index
    %c2 = arith.constant 2 : index
    %44 = vector.load %arg9[%c0_28, %c2] : memref<8x128xf32, #tpu.memory_space<vmem>>, vector<8x1xf32>
    tpu.vector_store %arg9[%c0_28, %c2], %40 {strides = array<i32>} : memref<8x128xf32, #tpu.memory_space<vmem>>, vector<8x1xf32>,
    return
  }
  func.func @transform_0(%arg0: i32) -> (i32, i32) {
    %c0_i32 = arith.constant 0 : i32
    %c0_i32_0 = arith.constant 0 : i32
    return %arg0, %c0_i32 : i32, i32
  }
  func.func @transform_1(%arg0: i32) -> (i32, i32) {
    %c0_i32 = arith.constant 0 : i32
    %c0_i32_0 = arith.constant 0 : i32
    %c0_i32_1 = arith.constant 0 : i32
    return %c0_i32, %c0_i32_0 : i32, i32
  }
  func.func @transform_2(%arg0: i32) -> (i32, i32) {
    %c0_i32 = arith.constant 0 : i32
    %c0_i32_0 = arith.constant 0 : i32
    %c0_i32_1 = arith.constant 0 : i32
    return %c0_i32, %c0_i32_0 : i32, i32
  }
  func.func @transform_3(%arg0: i32) -> (i32, i32) {
    %c0_i32 = arith.constant 0 : i32
    %c0_i32_0 = arith.constant 0 : i32
    %c0_i32_1 = arith.constant 0 : i32
    return %c0_i32, %c0_i32_0 : i32, i32
  }
  func.func @transform_4(%arg0: i32) -> (i32, i32) {
    %c0_i32 = arith.constant 0 : i32
    %c0_i32_0 = arith.constant 0 : i32
    %c0_i32_1 = arith.constant 0 : i32
    return %c0_i32, %c0_i32_0 : i32, i32
  }
  func.func @transform_5(%arg0: i32) -> (i32, i32) {
    %c0_i32 = arith.constant 0 : i32
    %c0_i32_0 = arith.constant 0 : i32
    %c0_i32_1 = arith.constant 0 : i32
    return %c0_i32, %c0_i32_0 : i32, i32
  }
  func.func @transform_6(%arg0: i32) -> (i32, i32) {
    %c0_i32 = arith.constant 0 : i32
    %c0_i32_0 = arith.constant 0 : i32
    %c0_i32_1 = arith.constant 0 : i32
    return %c0_i32, %c0_i32_0 : i32, i32
  }
  func.func @transform_7(%arg0: i32) -> (i32, i32) {
    %c0_i32 = arith.constant 0 : i32
    %c0_i32_0 = arith.constant 0 : i32
    return %arg0, %c0_i32 : i32, i32
  }
  func.func @transform_8(%arg0: i32) -> (i32, i32) {
    %c0_i32 = arith.constant 0 : i32
    %c0_i32_0 = arith.constant 0 : i32
    return %arg0, %c0_i32 : i32, i32
  }
}

</mosaic_0001>

<bundles_post_ra>
// kernel: tpu_custom_call.1
= control target key start
LH: loop header
LB: loop body
LE: loop exit
PB: predicated region body
PF: predicated region fallthrough
CT: control target
= control target key end

     0   :  { %13 = vsyncpa [#allocation3], 0  ;;  %s3400_s0 = inlined_call_operand.hbm [shape: f32[8,784], index: 0, kind: input, shape index: {}]   ;;  %s3401_s1 = inlined_call_operand.hbm [shape: bf16[784,512], index: 1, kind: input, shape index: {}]   ;;  %s3402_s2 = inlined_call_operand.vmem [shape: f32[1,512], index: 2, kind: input, shape index: {}]   ;;  %s3403_s3 = inlined_call_operand.hbm [shape: bf16[512,256], index: 3, kind: input, shape index: {}]   ;;  %s3404_s4 = inlined_call_operand.vmem [shape: f32[1,256], index: 4, kind: input, shape index: {}]   ;;  %s3405_s5 = inlined_call_operand.hbm [shape: bf16[256,128], index: 5, kind: input, shape index: {}]   ;;  %s3406_s6 = inlined_call_operand.vmem [shape: f32[1,128], index: 6, kind: input, shape index: {}]   ;;  %s3407_s7 = inlined_call_operand.vmem [shape: f32[8,2], index: 7, kind: input, shape index: {}]   ;;  %s3408_s8 = inlined_call_operand.hbm [shape: f32[8,128], index: 8, kind: output, shape index: {}]  }
   0x1   :  { %14 = vsyncpa [#allocation6], 0 }
   0x2   :  { %15 = vsyncpa [#allocation9], 0 }
   0x3   :  { %16 = vsyncpa [#allocation4], 0  ;;  %s3218_s27 = smov [#allocation5]   ;;  %s3100_s9 = scalar_lea.hbm %s3401_s1, 25088 }
   0x4   :  { %s32_s28 = sshll.u32 %s3218_s27, 4  ;;  %p3101_p0 = scmp.ne.s32.totalorder %s3401_s1, %s3100_s9  ;;  %s33_s28 = int_to_ptr.vmem [resolvable:$true] %s32_s28 }
   0x5   :  { %p3104_p1 = scmp.lt.u32.totalorder %s3100_s9, %s3401_s1 }
   0x7   :  { %p3106_p2 = pnand %p3104_p1, %p3101_p0 }
   0x9   :  { %3109 = shalt.err (!%p3106_p2)
}
   0xa   :  { %s3110_s14 = scalar_lea.vmem %s33_s28, 25088  ;;  %p3115_p4 = scmp.lt.s32.totalorder %s33_s28, %s33_s28 }
   0xb   :  { %p3111_p3 = scmp.ne.s32.totalorder %s33_s28, %s3110_s14  ;;  %p3116_p5 = scmp.lt.s32.totalorder %s3110_s14, %s3110_s14 }
   0xd   :  { %p3117_p6 = por %p3116_p5, %p3115_p4 }
   0xf   :  { %p3118_p7 = pnand %p3117_p6, %p3111_p3 }
  0x11   :  { %3121 = shalt.err (!%p3118_p7)
}
  0x12   :  { %s3219_s15 = smov 256   ;;  %s3220_s16 = smov 16  }
  0x13   :  { %38 = dma.hbm_to_vmem [thread:$0]  %s3401_s1, 25088, %s33_s28, [#allocation6], %s3219_s15, %s3219_s15, %s3220_s16  }
  0x14   :  { %s3221_s19 = smov [#allocation2]   ;;  %s3222_s21 = smov [#allocation7]  }
  0x15   :  { %s23_s20 = sshll.u32 %s3221_s19, 4  ;;  %s46_s22 = sshll.u32 %s3222_s21, 4  ;;  %s24_s20 = int_to_ptr.vmem [resolvable:$true] %s23_s20  ;;  %s47_s22 = int_to_ptr.vmem [resolvable:$true] %s46_s22 }
  0x16   :  { %s3122_s25 = scalar_lea.hbm %s3400_s0, 896 }
  0x17   :  { %p3123_p8 = scmp.ne.s32.totalorder %s3400_s0, %s3122_s25  ;;  %p3126_p9 = scmp.lt.u32.totalorder %s3122_s25, %s3400_s0 }
  0x19   :  { %p3128_p10 = pnand %p3126_p9, %p3123_p8 }
  0x1b   :  { %3131 = shalt.err (!%p3128_p10)
}
  0x1c   :  { %s3132_s1 = scalar_lea.vmem %s24_s20, 896  ;;  %p3137_p12 = scmp.lt.s32.totalorder %s24_s20, %s24_s20 }
  0x1d   :  { %p3133_p11 = scmp.ne.s32.totalorder %s24_s20, %s3132_s1  ;;  %p3138_p13 = scmp.lt.s32.totalorder %s3132_s1, %s3132_s1 }
  0x1f   :  { %p3139_p0 = por %p3138_p13, %p3137_p12 }
  0x21   :  { %p3140_p1 = pnand %p3139_p0, %p3133_p11 }
  0x23   :  { %3143 = shalt.err (!%p3140_p1)
}
  0x24   :  { %26 = dma.hbm_to_vmem [thread:$0]  %s3400_s0, 896, %s24_s20, [#allocation3]  }
  0x25   :  { %s3144_s12 = scalar_lea.hbm %s3403_s3, 8192 }
  0x26   :  { %p3145_p2 = scmp.ne.s32.totalorder %s3403_s3, %s3144_s12  ;;  %p3148_p3 = scmp.lt.u32.totalorder %s3144_s12, %s3403_s3 }
  0x28   :  { %p3150_p4 = pnand %p3148_p3, %p3145_p2 }
  0x2a   :  { %3153 = shalt.err (!%p3150_p4)
}
  0x2b   :  { %s3154_s17 = scalar_lea.vmem %s47_s22, 8192  ;;  %p3159_p6 = scmp.lt.s32.totalorder %s47_s22, %s47_s22 }
  0x2c   :  { %p3155_p5 = scmp.ne.s32.totalorder %s47_s22, %s3154_s17  ;;  %p3160_p7 = scmp.lt.s32.totalorder %s3154_s17, %s3154_s17 }
  0x2e   :  { %p3161_p8 = por %p3160_p7, %p3159_p6 }
  0x30   :  { %p3162_p9 = pnand %p3161_p8, %p3155_p5 }
  0x32   :  { %3165 = shalt.err (!%p3162_p9)
}
  0x33   :  { %s3223_s0 = smov 128   ;;  %s3224_s18 = smov 8  }
  0x34   :  { %52 = dma.hbm_to_vmem [thread:$0]  %s3403_s3, 8192, %s47_s22, [#allocation6], %s3223_s0, %s3223_s0, %s3224_s18  }
  0x35   :  { %s3225_s21 = smov [#allocation8]   ;;  %s3166_s26 = scalar_lea.hbm %s3405_s5, 2048 }
  0x36   :  { %s60_s23 = sshll.u32 %s3225_s21, 4  ;;  %p3167_p10 = scmp.ne.s32.totalorder %s3405_s5, %s3166_s26  ;;  %s61_s23 = int_to_ptr.vmem [resolvable:$true] %s60_s23 }
  0x37   :  { %p3170_p11 = scmp.lt.u32.totalorder %s3166_s26, %s3405_s5 }
  0x39   :  { %p3172_p12 = pnand %p3170_p11, %p3167_p10 }
  0x3b   :  { %3175 = shalt.err (!%p3172_p12)
}
  0x3c   :  { %s3176_s28 = scalar_lea.vmem %s61_s23, 2048  ;;  %p3181_p0 = scmp.lt.s32.totalorder %s61_s23, %s61_s23 }
  0x3d   :  { %p3177_p13 = scmp.ne.s32.totalorder %s61_s23, %s3176_s28  ;;  %p3182_p1 = scmp.lt.s32.totalorder %s3176_s28, %s3176_s28 }
  0x3f   :  { %p3183_p2 = por %p3182_p1, %p3181_p0 }
  0x41   :  { %p3184_p3 = pnand %p3183_p2, %p3177_p13 }
  0x43   :  { %3187 = shalt.err (!%p3184_p3)
}
  0x44   :  { %s3226_s3 = smov 64   ;;  %s3227_s22 = smov 4  }
  0x45   :  { %66 = dma.hbm_to_vmem [thread:$0]  %s3405_s5, 2048, %s61_s23, [#allocation9], %s3226_s3, %s3226_s3, %s3227_s22  }
  0x46   :  { %3210 = dma.done.wait [#allocation3], 896  }
  0x47   :  { %3211 = vsyncadd [#allocation3], 4294966400 }
  0x48   :  { %3212 = dma.done.wait [#allocation6], 33280  }
  0x49   :  { %3213 = vsyncadd [#allocation6], 4294934016 }
  0x4a   :  { %3214 = dma.done.wait [#allocation9], 2048  }
  0x4b   :  { %3215 = vsyncadd [#allocation9], 4294965248  ;;  %v2692_v0 = vld [vmem:[#allocation5 + $0x4] ss:$16 sps:$4 sm:$0xff]   ;;  %v2696_v2 = vld [vmem:[#allocation5] ss:$16 sps:$4 sm:$0xff]  }
  0x4c   :  { %v2694_v1 = vld [vmem:[#allocation5 + $0x204] ss:$16 sps:$4 sm:$0xff]   ;;  %1300 = vmatprep.subr.bf16.mxu1 %v2692_v0  ;;  %v2697_v3 = vld [vmem:[#allocation5 + $0x200] ss:$16 sps:$4 sm:$0xff]   ;;  %vm1296_vm0 = vcmask 130048   ;;  %s3229_s13 = smov 2  }
  0x4d   :  { %1341 = vmatprep.subr.bf16.mxu0 %v2694_v1  ;;  %v2698_v4 = vld [vmem:[#allocation5 + $0x24] ss:$16 sps:$4 sm:$0xff]   ;;  %1301 = vmatpush1.bf16.msra.mxu1 %v2696_v2  ;;  %v2702_v6 = vld [vmem:[#allocation5 + $0x20] ss:$16 sps:$4 sm:$0xff]   ;;  %vm2320_vm1 = vcmask 15360   ;;  %s3232_s16 = smov [#allocation10]  }
  0x4e   :  { %1342 = vmatpush1.bf16.msra.mxu0 %v2697_v3  ;;  %v2700_v5 = vld [vmem:[#allocation5 + $0x224] ss:$16 sps:$4 sm:$0xff]   ;;  %1302 = vmatprep.subr.bf16.mxu1 %v2698_v4  ;;  %v2703_v7 = vld [vmem:[#allocation5 + $0x220] ss:$16 sps:$4 sm:$0xff]   ;;  %v84_v4 = vld [vmem:[#allocation2] sm:$0xff]  ;;  %s2335_s17 = sshll.u32 %s3232_s16, 4  ;;  %s2336_s17 = int_to_ptr.vmem [resolvable:$true] %s2335_s17 }
  0x4f   :  { %1343 = vmatprep.subr.bf16.mxu0 %v2700_v5  ;;  %v2704_v8 = vld [vmem:[#allocation5 + $0x44] ss:$16 sps:$4 sm:$0xff]   ;;  %v2708_v10 = vld [vmem:[#allocation5 + $0x40] ss:$16 sps:$4 sm:$0xff]   ;;  %vm2327_vm2 = vcmask 23568   ;;  %s3188_s0 = scalar_lea.vmem %s2336_s17, 128  ;;  %p3193_p5 = scmp.lt.s32.totalorder %s2336_s17, %s2336_s17 }
  0x50   :  { %v2706_v9 = vld [vmem:[#allocation5 + $0x244] ss:$16 sps:$4 sm:$0xff]   ;;  %v2709_v11 = vld [vmem:[#allocation5 + $0x240] ss:$16 sps:$4 sm:$0xff]   ;;  %p3189_p4 = scmp.ne.s32.totalorder %s2336_s17, %s3188_s0  ;;  %p3194_p6 = scmp.lt.s32.totalorder %s3188_s0, %s3188_s0 }
  0x51   :  { %1303 = vmatpush1.bf16.msra.mxu1 %v2702_v6  ;;  %v2710_v12 = vld [vmem:[#allocation5 + $0x64] ss:$16 sps:$4 sm:$0xff]   ;;  %v2714_v14 = vld [vmem:[#allocation5 + $0x60] ss:$16 sps:$4 sm:$0xff]   ;;  %v86_v6 = vld [vmem:[#allocation2 + $0x10] sm:$0xff] }
  0x52   :  { %1344 = vmatpush1.bf16.msra.mxu0 %v2703_v7  ;;  %1304 = vmatprep.subr.bf16.mxu1 %v2704_v8  ;;  %v2712_v13 = vld [vmem:[#allocation5 + $0x264] ss:$16 sps:$4 sm:$0xff]   ;;  %v2715_v15 = vld [vmem:[#allocation5 + $0x260] ss:$16 sps:$4 sm:$0xff]   ;;  %v2793_v7 = vld [vmem:[#allocation5 + $0xc] ss:$16 sps:$4 sm:$0xff]   ;;  %v3332_v8 = vpack.c.bf16 %v84_v4, %v84_v4  ;;  %p3195_p7 = por %p3194_p6, %p3193_p5 }
  0x53   :  { %1345 = vmatprep.subr.bf16.mxu0 %v2706_v9  ;;  %v2716_v16 = vld [vmem:[#allocation5 + $0x84] ss:$16 sps:$4 sm:$0xff]   ;;  %v2720_v18 = vld [vmem:[#allocation5 + $0x80] ss:$16 sps:$4 sm:$0xff]   ;;  %v2877_v4 = vld [vmem:[#allocation5 + $0x1cc] ss:$16 sps:$4 sm:$0xff]  }
  0x54   :  { %v2718_v17 = vld [vmem:[#allocation5 + $0x284] ss:$16 sps:$4 sm:$0xff]   ;;  %v2721_v19 = vld [vmem:[#allocation5 + $0x280] ss:$16 sps:$4 sm:$0xff]   ;;  %p3196_p8 = pnand %p3195_p7, %p3189_p4 }
  0x55   :  { %1305 = vmatpush1.bf16.msra.mxu1 %v2708_v10  ;;  %v2722_v20 = vld [vmem:[#allocation5 + $0xa4] ss:$16 sps:$4 sm:$0xff]   ;;  %v2726_v22 = vld [vmem:[#allocation5 + $0xa0] ss:$16 sps:$4 sm:$0xff]   ;;  %v2791_v10 = vld [vmem:[#allocation5 + $0x8] ss:$16 sps:$4 sm:$0xff]  }
  0x56   :  { %1346 = vmatpush1.bf16.msra.mxu0 %v2709_v11  ;;  %1306 = vmatprep.subr.bf16.mxu1 %v2710_v12  ;;  %v2724_v21 = vld [vmem:[#allocation5 + $0x2a4] ss:$16 sps:$4 sm:$0xff]   ;;  %v2727_v23 = vld [vmem:[#allocation5 + $0x2a0] ss:$16 sps:$4 sm:$0xff]   ;;  %v3334_v11 = vpack.c.bf16 %v86_v6, %v86_v6  ;;  %v2875_v6 = vld [vmem:[#allocation5 + $0x1c8] ss:$16 sps:$4 sm:$0xff]  }
  0x57   :  { %1347 = vmatprep.subr.bf16.mxu0 %v2712_v13  ;;  %v2728_v24 = vld [vmem:[#allocation5 + $0xc4] ss:$16 sps:$4 sm:$0xff]   ;;  %v2732_v26 = vld [vmem:[#allocation5 + $0xc0] ss:$16 sps:$4 sm:$0xff]   ;;  %v2799_v13 = vld [vmem:[#allocation5 + $0x2c] ss:$16 sps:$4 sm:$0xff]  }
  0x58   :  { %v2730_v25 = vld [vmem:[#allocation5 + $0x2c4] ss:$16 sps:$4 sm:$0xff]   ;;  %v2733_v27 = vld [vmem:[#allocation5 + $0x2c0] ss:$16 sps:$4 sm:$0xff]  }
  0x59   :  { %1307 = vmatpush1.bf16.msra.mxu1 %v2714_v14  ;;  %v2734_v28 = vld [vmem:[#allocation5 + $0xe4] ss:$16 sps:$4 sm:$0xff]   ;;  %v2738_v30 = vld [vmem:[#allocation5 + $0xe0] ss:$16 sps:$4 sm:$0xff]  }
  0x5a   :  { %1348 = vmatpush1.bf16.msra.mxu0 %v2715_v15  ;;  %1308 = vmatprep.subr.bf16.mxu1 %v2716_v16  ;;  %v2736_v29 = vld [vmem:[#allocation5 + $0x2e4] ss:$16 sps:$4 sm:$0xff]   ;;  %v2739_v31 = vld [vmem:[#allocation5 + $0x2e0] ss:$16 sps:$4 sm:$0xff]   ;;  %v2797_v15 = vld [vmem:[#allocation5 + $0x28] ss:$16 sps:$4 sm:$0xff]  }
  0x5b   :  { %1349 = vmatprep.subr.bf16.mxu0 %v2718_v17  ;;  %v2740_v32 = vld [vmem:[#allocation5 + $0x104] ss:$16 sps:$4 sm:$0xff]   ;;  %v2744_v34 = vld [vmem:[#allocation5 + $0x100] ss:$16 sps:$4 sm:$0xff]   ;;  %v2805_v17 = vld [vmem:[#allocation5 + $0x4c] ss:$16 sps:$4 sm:$0xff]  }
  0x5c   :  { %v2742_v33 = vld [vmem:[#allocation5 + $0x304] ss:$16 sps:$4 sm:$0xff]   ;;  %v2745_v35 = vld [vmem:[#allocation5 + $0x300] ss:$16 sps:$4 sm:$0xff]  }
  0x5d   :  { %1309 = vmatpush1.bf16.msra.mxu1 %v2720_v18  ;;  %v2746_v36 = vld [vmem:[#allocation5 + $0x124] ss:$16 sps:$4 sm:$0xff]   ;;  %v2750_v38 = vld [vmem:[#allocation5 + $0x120] ss:$16 sps:$4 sm:$0xff]  }
  0x5e   :  { %1350 = vmatpush1.bf16.msra.mxu0 %v2721_v19  ;;  %1310 = vmatprep.subr.bf16.mxu1 %v2722_v20  ;;  %v2748_v37 = vld [vmem:[#allocation5 + $0x324] ss:$16 sps:$4 sm:$0xff]   ;;  %v2751_v39 = vld [vmem:[#allocation5 + $0x320] ss:$16 sps:$4 sm:$0xff]   ;;  %v2803_v19 = vld [vmem:[#allocation5 + $0x48] ss:$16 sps:$4 sm:$0xff]  }
  0x5f   :  { %1351 = vmatprep.subr.bf16.mxu0 %v2724_v21  ;;  %v2752_v40 = vld [vmem:[#allocation5 + $0x144] ss:$16 sps:$4 sm:$0xff]   ;;  %v2756_v42 = vld [vmem:[#allocation5 + $0x140] ss:$16 sps:$4 sm:$0xff]   ;;  %v2811_v21 = vld [vmem:[#allocation5 + $0x6c] ss:$16 sps:$4 sm:$0xff]  }
  0x60   :  { %v2754_v41 = vld [vmem:[#allocation5 + $0x344] ss:$16 sps:$4 sm:$0xff]   ;;  %v2757_v43 = vld [vmem:[#allocation5 + $0x340] ss:$16 sps:$4 sm:$0xff]  }
  0x61   :  { %1311 = vmatpush1.bf16.msra.mxu1 %v2726_v22  ;;  %v2758_v44 = vld [vmem:[#allocation5 + $0x164] ss:$16 sps:$4 sm:$0xff]   ;;  %v2762_v47 = vld [vmem:[#allocation5 + $0x160] ss:$16 sps:$4 sm:$0xff]  }
  0x62   :  { %1352 = vmatpush1.bf16.msra.mxu0 %v2727_v23  ;;  %1312 = vmatprep.subr.bf16.mxu1 %v2728_v24  ;;  %v2760_v45 = vld [vmem:[#allocation5 + $0x364] ss:$16 sps:$4 sm:$0xff]   ;;  %v2763_v50 = vld [vmem:[#allocation5 + $0x360] ss:$16 sps:$4 sm:$0xff]   ;;  %v2809_v23 = vld [vmem:[#allocation5 + $0x68] ss:$16 sps:$4 sm:$0xff]  }
  0x63   :  { %1353 = vmatprep.subr.bf16.mxu0 %v2730_v25  ;;  %v85_v46 = vld [vmem:[#allocation2 + $0x8] sm:$0xff]  ;;  %v87_v49 = vld [vmem:[#allocation2 + $0x18] sm:$0xff]  ;;  %v2817_v25 = vld [vmem:[#allocation5 + $0x8c] ss:$16 sps:$4 sm:$0xff]  }
  0x64   :  { %v3326_v48 = vpack.c.bf16 %v85_v46, %v85_v46  ;;  %v2764_v51 = vld [vmem:[#allocation5 + $0x184] ss:$16 sps:$4 sm:$0xff]   ;;  %v3328_v52 = vpack.c.bf16 %v87_v49, %v87_v49  ;;  %v2768_v54 = vld [vmem:[#allocation5 + $0x180] ss:$16 sps:$4 sm:$0xff]   ;;  %v2845_v49 = vld [vmem:[#allocation5 + $0x128] ss:$16 sps:$4 sm:$0xff]  }
  0x65   :  { %1313 = vmatpush1.bf16.msra.mxu1 %v2732_v26  ;;  %v2766_v53 = vld [vmem:[#allocation5 + $0x384] ss:$16 sps:$4 sm:$0xff]   ;;  %v2769_v55 = vld [vmem:[#allocation5 + $0x380] ss:$16 sps:$4 sm:$0xff]  }
  0x66   :  { %1354 = vmatpush1.bf16.msra.mxu0 %v2733_v27  ;;  %1314 = vmatprep.subr.bf16.mxu1 %v2734_v28  ;;  %v2770_v56 = vld [vmem:[#allocation5 + $0x1a4] ss:$16 sps:$4 sm:$0xff]   ;;  %v2774_v58 = vld [vmem:[#allocation5 + $0x1a0] ss:$16 sps:$4 sm:$0xff]   ;;  %v2815_v27 = vld [vmem:[#allocation5 + $0x88] ss:$16 sps:$4 sm:$0xff]  }
  0x67   :  { %1355 = vmatprep.subr.bf16.mxu0 %v2736_v29  ;;  %1332 = vmatprep.mubr.bf16.mxu1 %v3326_v48  ;;  %v2772_v57 = vld [vmem:[#allocation5 + $0x3a4] ss:$16 sps:$4 sm:$0xff]   ;;  %v2775_v59 = vld [vmem:[#allocation5 + $0x3a0] ss:$16 sps:$4 sm:$0xff]   ;;  %v2823_v29 = vld [vmem:[#allocation5 + $0xac] ss:$16 sps:$4 sm:$0xff]  }
  0x68   :  { %1373 = vmatprep.mubr.bf16.mxu0 %v3328_v52  ;;  %v2776_v60 = vld [vmem:[#allocation5 + $0x1c4] ss:$16 sps:$4 sm:$0xff]   ;;  %v2780_v62 = vld [vmem:[#allocation5 + $0x1c0] ss:$16 sps:$4 sm:$0xff]  }
  0x69   :  { %1315 = vmatpush1.bf16.msra.mxu1 %v2738_v30  ;;  %v2778_v61 = vld [vmem:[#allocation5 + $0x3c4] ss:$16 sps:$4 sm:$0xff]   ;;  %v2781_v63 = vld [vmem:[#allocation5 + $0x3c0] ss:$16 sps:$4 sm:$0xff]  }
  0x6a   :  { %1356 = vmatpush1.bf16.msra.mxu0 %v2739_v31  ;;  %1316 = vmatprep.subr.bf16.mxu1 %v2740_v32  ;;  %v2782_v0 = vld [vmem:[#allocation5 + $0x1e4] ss:$16 sps:$4 sm:$0xff]   ;;  %v2786_v2 = vld [vmem:[#allocation5 + $0x1e0] ss:$16 sps:$4 sm:$0xff]   ;;  %v2821_v31 = vld [vmem:[#allocation5 + $0xa8] ss:$16 sps:$4 sm:$0xff]  }
  0x6b   :  { %1357 = vmatprep.subr.bf16.mxu0 %v2742_v33  ;;  %v2784_v1 = vld [vmem:[#allocation5 + $0x3e4] ss:$16 sps:$4 sm:$0xff]   ;;  %v2787_v3 = vld [vmem:[#allocation5 + $0x3e0] ss:$16 sps:$4 sm:$0xff]   ;;  %v2829_v33 = vld [vmem:[#allocation5 + $0xcc] ss:$16 sps:$4 sm:$0xff]  }
  0x6c   :  { %v2790_v5 = vld [vmem:[#allocation5 + $0x404] ss:$16 sps:$4 sm:$0xff]   ;;  %v2788_v9 = vld [vmem:[#allocation5 + $0x400] ss:$16 sps:$4 sm:$0xff]  }
  0x6d   :  { %1317 = vmatpush1.bf16.msra.mxu1 %v2744_v34  ;;  %v2796_v12 = vld [vmem:[#allocation5 + $0x424] ss:$16 sps:$4 sm:$0xff]   ;;  %v2794_v14 = vld [vmem:[#allocation5 + $0x420] ss:$16 sps:$4 sm:$0xff]  }
  0x6e   :  { %1358 = vmatpush1.bf16.msra.mxu0 %v2745_v35  ;;  %1318 = vmatprep.subr.bf16.mxu1 %v2746_v36  ;;  %v2802_v16 = vld [vmem:[#allocation5 + $0x444] ss:$16 sps:$4 sm:$0xff]   ;;  %v2800_v18 = vld [vmem:[#allocation5 + $0x440] ss:$16 sps:$4 sm:$0xff]  }
  0x6f   :  { %1359 = vmatprep.subr.bf16.mxu0 %v2748_v37  ;;  %v2808_v20 = vld [vmem:[#allocation5 + $0x464] ss:$16 sps:$4 sm:$0xff]   ;;  %v2806_v22 = vld [vmem:[#allocation5 + $0x460] ss:$16 sps:$4 sm:$0xff]   ;;  %v2827_v37 = vld [vmem:[#allocation5 + $0xc8] ss:$16 sps:$4 sm:$0xff]  }
  0x70   :  { %v2814_v24 = vld [vmem:[#allocation5 + $0x484] ss:$16 sps:$4 sm:$0xff]   ;;  %v2812_v26 = vld [vmem:[#allocation5 + $0x480] ss:$16 sps:$4 sm:$0xff]  }
  0x71   :  { %1319 = vmatpush1.bf16.msra.mxu1 %v2750_v38  ;;  %v2820_v28 = vld [vmem:[#allocation5 + $0x4a4] ss:$16 sps:$4 sm:$0xff]   ;;  %v2818_v30 = vld [vmem:[#allocation5 + $0x4a0] ss:$16 sps:$4 sm:$0xff]  }
  0x72   :  { %1360 = vmatpush1.bf16.msra.mxu0 %v2751_v39  ;;  %1320 = vmatprep.subr.bf16.mxu1 %v2752_v40  ;;  %v2826_v32 = vld [vmem:[#allocation5 + $0x4c4] ss:$16 sps:$4 sm:$0xff]   ;;  %v2824_v36 = vld [vmem:[#allocation5 + $0x4c0] ss:$16 sps:$4 sm:$0xff]   ;;  %v2835_v39 = vld [vmem:[#allocation5 + $0xec] ss:$16 sps:$4 sm:$0xff]  }
  0x73   :  { %1361 = vmatprep.subr.bf16.mxu0 %v2754_v41  ;;  %v89_v34 = vld [vmem:[#allocation2 + $0x28] sm:$0xff]  ;;  %v2833_v41 = vld [vmem:[#allocation5 + $0xe8] ss:$16 sps:$4 sm:$0xff]  }
  0x74   :  { %v3339_v35 = vpack.c.bf16 %v89_v34, %v89_v34  ;;  %v2832_v38 = vld [vmem:[#allocation5 + $0x4e4] ss:$16 sps:$4 sm:$0xff]   ;;  %v2830_v40 = vld [vmem:[#allocation5 + $0x4e0] ss:$16 sps:$4 sm:$0xff]   ;;  %v2910_v34 = vld [vmem:[#allocation5 + $0x2ec] ss:$16 sps:$4 sm:$0xff]  }
  0x75   :  { %1321 = vmatpush1.bf16.msra.mxu1 %v2756_v42  ;;  %v2838_v42 = vld [vmem:[#allocation5 + $0x504] ss:$16 sps:$4 sm:$0xff]  }
  0x76   :  { %1362 = vmatpush1.bf16.msra.mxu0 %v2757_v43  ;;  %1322 = vmatprep.subr.bf16.mxu1 %v2758_v44  ;;  %v2841_v43 = vld [vmem:[#allocation5 + $0x10c] ss:$16 sps:$4 sm:$0xff]   ;;  %v2836_v44 = vld [vmem:[#allocation5 + $0x500] ss:$16 sps:$4 sm:$0xff]   ;;  %v2844_v46 = vld [vmem:[#allocation5 + $0x524] ss:$16 sps:$4 sm:$0xff]  }
  0x77   :  { %1363 = vmatprep.subr.bf16.mxu0 %v2760_v45  ;;  %v2839_v45 = vld [vmem:[#allocation5 + $0x108] ss:$16 sps:$4 sm:$0xff]  }
  0x79   :  { %1323 = vmatpush1.bf16.msra.mxu1 %v2762_v47  ;;  %v2847_v47 = vld [vmem:[#allocation5 + $0x12c] ss:$16 sps:$4 sm:$0xff]  }
  0x7a   :  { %1364 = vmatpush1.bf16.msra.mxu0 %v2763_v50  ;;  %1324 = vmatprep.subr.bf16.mxu1 %v2764_v51  ;;  %v2850_v50 = vld [vmem:[#allocation5 + $0x544] ss:$16 sps:$4 sm:$0xff]   ;;  %v2853_v51 = vld [vmem:[#allocation5 + $0x14c] ss:$16 sps:$4 sm:$0xff]  }
  0x7b   :  { %1365 = vmatprep.subr.bf16.mxu0 %v2766_v53  ;;  %v2848_v53 = vld [vmem:[#allocation5 + $0x540] ss:$16 sps:$4 sm:$0xff]  }
  0x7d   :  { %1325 = vmatpush1.bf16.msra.mxu1 %v2768_v54  ;;  %v2851_v54 = vld [vmem:[#allocation5 + $0x148] ss:$16 sps:$4 sm:$0xff]  }
  0x7e   :  { %1366 = vmatpush1.bf16.msra.mxu0 %v2769_v55  ;;  %1326 = vmatprep.subr.bf16.mxu1 %v2770_v56  ;;  %v2856_v55 = vld [vmem:[#allocation5 + $0x564] ss:$16 sps:$4 sm:$0xff]   ;;  %v2859_v56 = vld [vmem:[#allocation5 + $0x16c] ss:$16 sps:$4 sm:$0xff]  }
  0x7f   :  { %1367 = vmatprep.subr.bf16.mxu0 %v2772_v57  ;;  %v2854_v57 = vld [vmem:[#allocation5 + $0x560] ss:$16 sps:$4 sm:$0xff]  }
  0x81   :  { %1327 = vmatpush1.bf16.msra.mxu1 %v2774_v58  ;;  %v2857_v58 = vld [vmem:[#allocation5 + $0x168] ss:$16 sps:$4 sm:$0xff]  }
  0x82   :  { %1368 = vmatpush1.bf16.msra.mxu0 %v2775_v59  ;;  %1328 = vmatprep.subr.bf16.mxu1 %v2776_v60  ;;  %v2862_v59 = vld [vmem:[#allocation5 + $0x584] ss:$16 sps:$4 sm:$0xff]   ;;  %v2865_v60 = vld [vmem:[#allocation5 + $0x18c] ss:$16 sps:$4 sm:$0xff]  }
  0x83   :  { %1369 = vmatprep.subr.bf16.mxu0 %v2778_v61  ;;  %v2860_v61 = vld [vmem:[#allocation5 + $0x580] ss:$16 sps:$4 sm:$0xff]  }
  0x85   :  { %1329 = vmatpush1.bf16.msra.mxu1 %v2780_v62  ;;  %v2863_v62 = vld [vmem:[#allocation5 + $0x188] ss:$16 sps:$4 sm:$0xff]  }
  0x86   :  { %1370 = vmatpush1.bf16.msra.mxu0 %v2781_v63  ;;  %1330 = vmatprep.subr.bf16.mxu1 %v2782_v0  ;;  %v2868_v63 = vld [vmem:[#allocation5 + $0x5a4] ss:$16 sps:$4 sm:$0xff]   ;;  %v2871_v0 = vld [vmem:[#allocation5 + $0x1ac] ss:$16 sps:$4 sm:$0xff]  }
  0x87   :  { %1371 = vmatprep.subr.bf16.mxu0 %v2784_v1  ;;  %v2866_v1 = vld [vmem:[#allocation5 + $0x5a0] ss:$16 sps:$4 sm:$0xff]  }
  0x89   :  { %1331 = vmatpush1.bf16.msra.mxu1 %v2786_v2  ;;  %v2869_v2 = vld [vmem:[#allocation5 + $0x1a8] ss:$16 sps:$4 sm:$0xff]  }
  0x8a   :  { %1372 = vmatpush1.bf16.msra.mxu0 %v2787_v3  ;;  %1464 = vmatprep.subr.bf16.mxu1 %v2793_v7  ;;  %v2874_v3 = vld [vmem:[#allocation5 + $0x5c4] ss:$16 sps:$4 sm:$0xff]  }
  0x8b   :  { %1382 = vmatprep.subr.bf16.mxu0 %v2790_v5  ;;  %v2872_v5 = vld [vmem:[#allocation5 + $0x5c0] ss:$16 sps:$4 sm:$0xff]   ;;  %v2880_v7 = vld [vmem:[#allocation5 + $0x5e4] ss:$16 sps:$4 sm:$0xff]  }
  0x8c   :  { %1333 = vmatmul.mubr.bf16.vlgmr.msra.gmra.mrb[0].mxu1 %v3332_v8 }
  0x8d   :  { %1374 = vmatmul.mubr.bf16.vlgmr.msra.gmra.mrb[0].mxu0 %v3334_v11  ;;  %1465 = vmatpush1.bf16.msra.mxu1 %v2791_v10  ;;  %v2878_v10 = vld [vmem:[#allocation5 + $0x5e0] ss:$16 sps:$4 sm:$0xff]  }
  0x8e   :  { %1383 = vmatpush1.bf16.msra.mxu0 %v2788_v9  ;;  %1466 = vmatprep.subr.bf16.mxu1 %v2799_v13  ;;  %v2883_v9 = vld [vmem:[#allocation5 + $0x1ec] ss:$16 sps:$4 sm:$0xff]  }
  0x8f   :  { %1384 = vmatprep.subr.bf16.mxu0 %v2796_v12  ;;  %1496 = vmatprep.mubr.bf16.mxu1 %v3326_v48  ;;  %v2842_v48 = vld [vmem:[#allocation5 + $0x520] ss:$16 sps:$4 sm:$0xff]   ;;  %v2881_v12 = vld [vmem:[#allocation5 + $0x1e8] ss:$16 sps:$4 sm:$0xff]  }
  0x90   :  { %1414 = vmatprep.mubr.bf16.mxu0 %v3339_v35  ;;  %v88_v13 = vld [vmem:[#allocation2 + $0x20] sm:$0xff] }
  0x91   :  { %1467 = vmatpush1.bf16.msra.mxu1 %v2797_v15  ;;  %v2892_v15 = vld [vmem:[#allocation5 + $0x604] ss:$16 sps:$4 sm:$0xff]  }
  0x92   :  { %1385 = vmatpush1.bf16.msra.mxu0 %v2794_v14  ;;  %1468 = vmatprep.subr.bf16.mxu1 %v2805_v17  ;;  %v2886_v14 = vld [vmem:[#allocation5 + $0x20c] ss:$16 sps:$4 sm:$0xff]   ;;  %v2884_v17 = vld [vmem:[#allocation5 + $0x208] ss:$16 sps:$4 sm:$0xff]  }
  0x93   :  { %1386 = vmatprep.subr.bf16.mxu0 %v2802_v16  ;;  %v3342_v16 = vpack.c.bf16 %v88_v13, %v88_v13  ;;  %v3018_v13 = vld [vmem:[#allocation7 + $0xa4] ss:$8 sps:$4 sm:$0xff]  }
  0x95   :  { %1469 = vmatpush1.bf16.msra.mxu1 %v2803_v19  ;;  %v2889_v19 = vld [vmem:[#allocation5 + $0x22c] ss:$16 sps:$4 sm:$0xff]  }
  0x96   :  { %1387 = vmatpush1.bf16.msra.mxu0 %v2800_v18  ;;  %1470 = vmatprep.subr.bf16.mxu1 %v2811_v21  ;;  %v2890_v18 = vld [vmem:[#allocation5 + $0x600] ss:$16 sps:$4 sm:$0xff]   ;;  %v2887_v21 = vld [vmem:[#allocation5 + $0x228] ss:$16 sps:$4 sm:$0xff]  }
  0x97   :  { %1388 = vmatprep.subr.bf16.mxu0 %v2808_v20  ;;  %v2982_v20 = vld [vmem:[#allocation5 + $0x60c] ss:$16 sps:$4 sm:$0xff]  }
  0x99   :  { %1471 = vmatpush1.bf16.msra.mxu1 %v2809_v23  ;;  %v3228_v23 = vmov 0  }
  0x9a   :  { %1389 = vmatpush1.bf16.msra.mxu0 %v2806_v22  ;;  %1472 = vmatprep.subr.bf16.mxu1 %v2817_v25  ;;  %v2895_v22 = vld [vmem:[#allocation5 + $0x24c] ss:$16 sps:$4 sm:$0xff]  }
  0x9b   :  { %1390 = vmatprep.subr.bf16.mxu0 %v2814_v24  ;;  %v2893_v24 = vld [vmem:[#allocation5 + $0x248] ss:$16 sps:$4 sm:$0xff]  }
  0x9c   :  { %v90_v25 = vld [vmem:[#allocation2 + $0x30] sm:$0xff] }
  0x9d   :  { %1473 = vmatpush1.bf16.msra.mxu1 %v2815_v27  ;;  %v2896_v27 = vld [vmem:[#allocation5 + $0x268] ss:$16 sps:$4 sm:$0xff]  }
  0x9e   :  { %1391 = vmatpush1.bf16.msra.mxu0 %v2812_v26  ;;  %1474 = vmatprep.subr.bf16.mxu1 %v2823_v29  ;;  %v2898_v26 = vld [vmem:[#allocation5 + $0x26c] ss:$16 sps:$4 sm:$0xff]   ;;  %v97_v29 = vpack.c.bf16 %v90_v25, %v90_v25  ;;  %v3022_v25 = vld [vmem:[#allocation7 + $0xc0] ss:$8 sps:$4 sm:$0xff]  }
  0x9f   :  { %1392 = vmatprep.subr.bf16.mxu0 %v2820_v28  ;;  %v2980_v28 = vld [vmem:[#allocation5 + $0x608] ss:$16 sps:$4 sm:$0xff]  }
  0xa1   :  { %1475 = vmatpush1.bf16.msra.mxu1 %v2821_v31  ;;  %v2904_v31 = vld [vmem:[#allocation5 + $0x2ac] ss:$16 sps:$4 sm:$0xff]  }
  0xa2   :  { %1393 = vmatpush1.bf16.msra.mxu0 %v2818_v30  ;;  %1476 = vmatprep.subr.bf16.mxu1 %v2829_v33  ;;  %v2899_v30 = vld [vmem:[#allocation5 + $0x288] ss:$16 sps:$4 sm:$0xff]  }
  0xa3   :  { %1394 = vmatprep.subr.bf16.mxu0 %v2826_v32  ;;  %v2902_v32 = vld [vmem:[#allocation5 + $0x2a8] ss:$16 sps:$4 sm:$0xff]  }
  0xa4   :  { %v2905_v33 = vld [vmem:[#allocation5 + $0x2c8] ss:$16 sps:$4 sm:$0xff]  }
  0xa5   :  { %1477 = vmatpush1.bf16.msra.mxu1 %v2827_v37  ;;  %v2988_v37 = vld [vmem:[#allocation7 + $0x4] ss:$8 sps:$4 sm:$0xff]  }
  0xa6   :  { %1395 = vmatpush1.bf16.msra.mxu0 %v2824_v36  ;;  %1478 = vmatprep.subr.bf16.mxu1 %v2835_v39  ;;  %v2986_v36 = vld [vmem:[#allocation7] ss:$8 sps:$4 sm:$0xff]  }
  0xa7   :  { %1396 = vmatprep.subr.bf16.mxu0 %v2832_v38  ;;  %v2991_v38 = vld [vmem:[#allocation7 + $0x14] ss:$8 sps:$4 sm:$0xff]   ;;  %v2908_v39 = vld [vmem:[#allocation5 + $0x2e8] ss:$16 sps:$4 sm:$0xff]  }
  0xa9   :  { %1479 = vmatpush1.bf16.msra.mxu1 %v2833_v41  ;;  %v2913_v41 = vld [vmem:[#allocation5 + $0x30c] ss:$16 sps:$4 sm:$0xff]  }
  0xaa   :  { %1397 = vmatpush1.bf16.msra.mxu0 %v2830_v40  ;;  %1480 = vmatprep.subr.bf16.mxu1 %v2841_v43  ;;  %v2989_v40 = vld [vmem:[#allocation7 + $0x10] ss:$8 sps:$4 sm:$0xff]  }
  0xab   :  { %1398 = vmatprep.subr.bf16.mxu0 %v2838_v42  ;;  %v2994_v42 = vld [vmem:[#allocation7 + $0x24] ss:$8 sps:$4 sm:$0xff]   ;;  %v2911_v43 = vld [vmem:[#allocation5 + $0x308] ss:$16 sps:$4 sm:$0xff]  }
  0xad   :  { %1481 = vmatpush1.bf16.msra.mxu1 %v2839_v45  ;;  %v2916_v45 = vld [vmem:[#allocation5 + $0x32c] ss:$16 sps:$4 sm:$0xff]  }
  0xae   :  { %1399 = vmatpush1.bf16.msra.mxu0 %v2836_v44  ;;  %1482 = vmatprep.subr.bf16.mxu1 %v2847_v47  ;;  %v2992_v44 = vld [vmem:[#allocation7 + $0x20] ss:$8 sps:$4 sm:$0xff]  }
  0xaf   :  { %1400 = vmatprep.subr.bf16.mxu0 %v2844_v46  ;;  %v2997_v46 = vld [vmem:[#allocation7 + $0x34] ss:$8 sps:$4 sm:$0xff]   ;;  %v2914_v47 = vld [vmem:[#allocation5 + $0x328] ss:$16 sps:$4 sm:$0xff]  }
  0xb1   :  { %1483 = vmatpush1.bf16.msra.mxu1 %v2845_v49  ;;  %v2919_v49 = vld [vmem:[#allocation5 + $0x34c] ss:$16 sps:$4 sm:$0xff]  }
  0xb2   :  { %1401 = vmatpush1.bf16.msra.mxu0 %v2842_v48  ;;  %1484 = vmatprep.subr.bf16.mxu1 %v2853_v51  ;;  %v2995_v48 = vld [vmem:[#allocation7 + $0x30] ss:$8 sps:$4 sm:$0xff]  }
  0xb3   :  { %1402 = vmatprep.subr.bf16.mxu0 %v2850_v50  ;;  %v3000_v50 = vld [vmem:[#allocation7 + $0x44] ss:$8 sps:$4 sm:$0xff]   ;;  %v2917_v51 = vld [vmem:[#allocation5 + $0x348] ss:$16 sps:$4 sm:$0xff]  }
  0xb5   :  { %1485 = vmatpush1.bf16.msra.mxu1 %v2851_v54  ;;  %v2922_v54 = vld [vmem:[#allocation5 + $0x36c] ss:$16 sps:$4 sm:$0xff]  }
  0xb6   :  { %1403 = vmatpush1.bf16.msra.mxu0 %v2848_v53  ;;  %1486 = vmatprep.subr.bf16.mxu1 %v2859_v56  ;;  %v2998_v53 = vld [vmem:[#allocation7 + $0x40] ss:$8 sps:$4 sm:$0xff]  }
  0xb7   :  { %1404 = vmatprep.subr.bf16.mxu0 %v2856_v55  ;;  %v3003_v55 = vld [vmem:[#allocation7 + $0x54] ss:$8 sps:$4 sm:$0xff]   ;;  %v2920_v56 = vld [vmem:[#allocation5 + $0x368] ss:$16 sps:$4 sm:$0xff]  }
  0xb9   :  { %1487 = vmatpush1.bf16.msra.mxu1 %v2857_v58  ;;  %v2925_v58 = vld [vmem:[#allocation5 + $0x38c] ss:$16 sps:$4 sm:$0xff]  }
  0xba   :  { %1405 = vmatpush1.bf16.msra.mxu0 %v2854_v57  ;;  %1488 = vmatprep.subr.bf16.mxu1 %v2865_v60  ;;  %v3001_v57 = vld [vmem:[#allocation7 + $0x50] ss:$8 sps:$4 sm:$0xff]  }
  0xbb   :  { %1406 = vmatprep.subr.bf16.mxu0 %v2862_v59  ;;  %v3006_v59 = vld [vmem:[#allocation7 + $0x64] ss:$8 sps:$4 sm:$0xff]   ;;  %v2923_v60 = vld [vmem:[#allocation5 + $0x388] ss:$16 sps:$4 sm:$0xff]  }
  0xbd   :  { %1489 = vmatpush1.bf16.msra.mxu1 %v2863_v62  ;;  %v2928_v62 = vld [vmem:[#allocation5 + $0x3ac] ss:$16 sps:$4 sm:$0xff]  }
  0xbe   :  { %1407 = vmatpush1.bf16.msra.mxu0 %v2860_v61  ;;  %1490 = vmatprep.subr.bf16.mxu1 %v2871_v0  ;;  %v3004_v61 = vld [vmem:[#allocation7 + $0x60] ss:$8 sps:$4 sm:$0xff]  }
  0xbf   :  { %1408 = vmatprep.subr.bf16.mxu0 %v2868_v63  ;;  %v3009_v63 = vld [vmem:[#allocation7 + $0x74] ss:$8 sps:$4 sm:$0xff]   ;;  %v2926_v0 = vld [vmem:[#allocation5 + $0x3a8] ss:$16 sps:$4 sm:$0xff]  }
  0xc1   :  { %1491 = vmatpush1.bf16.msra.mxu1 %v2869_v2  ;;  %v2931_v2 = vld [vmem:[#allocation5 + $0x3cc] ss:$16 sps:$4 sm:$0xff]  }
  0xc2   :  { %1409 = vmatpush1.bf16.msra.mxu0 %v2866_v1  ;;  %1492 = vmatprep.subr.bf16.mxu1 %v2877_v4  ;;  %v3007_v1 = vld [vmem:[#allocation7 + $0x70] ss:$8 sps:$4 sm:$0xff]  }
  0xc3   :  { %1410 = vmatprep.subr.bf16.mxu0 %v2874_v3  ;;  %v3012_v3 = vld [vmem:[#allocation7 + $0x84] ss:$8 sps:$4 sm:$0xff]   ;;  %v2929_v4 = vld [vmem:[#allocation5 + $0x3c8] ss:$16 sps:$4 sm:$0xff]  }
  0xc5   :  { %1493 = vmatpush1.bf16.msra.mxu1 %v2875_v6  ;;  %v2934_v6 = vld [vmem:[#allocation5 + $0x3ec] ss:$16 sps:$4 sm:$0xff]  }
  0xc6   :  { %1411 = vmatpush1.bf16.msra.mxu0 %v2872_v5  ;;  %1494 = vmatprep.subr.bf16.mxu1 %v2883_v9  ;;  %v3010_v5 = vld [vmem:[#allocation7 + $0x80] ss:$8 sps:$4 sm:$0xff]  }
  0xc7   :  { %1412 = vmatprep.subr.bf16.mxu0 %v2880_v7  ;;  %v3015_v7 = vld [vmem:[#allocation7 + $0x94] ss:$8 sps:$4 sm:$0xff]   ;;  %v2932_v9 = vld [vmem:[#allocation5 + $0x3e8] ss:$16 sps:$4 sm:$0xff]  }
  0xc9   :  { %1495 = vmatpush1.bf16.msra.mxu1 %v2881_v12  ;;  %v2937_v12 = vld [vmem:[#allocation5 + $0x40c] ss:$16 sps:$4 sm:$0xff]  }
  0xca   :  { %1413 = vmatpush1.bf16.msra.mxu0 %v2878_v10  ;;  %1505 = vmatprep.subr.bf16.mxu1 %v2886_v14  ;;  %v3013_v10 = vld [vmem:[#allocation7 + $0x90] ss:$8 sps:$4 sm:$0xff]  }
  0xcb   :  { %1423 = vmatprep.subr.bf16.mxu0 %v2892_v15  ;;  %v2935_v14 = vld [vmem:[#allocation5 + $0x408] ss:$16 sps:$4 sm:$0xff]   ;;  %v2940_v15 = vld [vmem:[#allocation5 + $0x42c] ss:$16 sps:$4 sm:$0xff]  }
  0xcc   :  { %1497 = vmatmul.mubr.bf16.vlgmr.msra.gmra.mrb[4].mxu1 %v3332_v8  ;;  %v2901_v8 = vld [vmem:[#allocation5 + $0x28c] ss:$16 sps:$4 sm:$0xff]  }
  0xcd   :  { %1415 = vmatmul.mubr.bf16.vlgmr.msra.gmra.mrb[0].mxu0 %v3342_v16  ;;  %1506 = vmatpush1.bf16.msra.mxu1 %v2884_v17  ;;  %v3016_v17 = vld [vmem:[#allocation7 + $0xa0] ss:$8 sps:$4 sm:$0xff]  }
  0xce   :  { %1424 = vmatpush1.bf16.msra.mxu0 %v2890_v18  ;;  %1507 = vmatprep.subr.bf16.mxu1 %v2889_v19  ;;  %v3021_v18 = vld [vmem:[#allocation7 + $0xb4] ss:$8 sps:$4 sm:$0xff]   ;;  %v2938_v19 = vld [vmem:[#allocation5 + $0x428] ss:$16 sps:$4 sm:$0xff]  }
  0xcf   :  { %1455 = vmatprep.mubr.bf16.mxu0 %v3228_v23  ;;  %1537 = vmatprep.mubr.bf16.mxu1 %v3328_v52  ;;  %v2907_v52 = vld [vmem:[#allocation5 + $0x2cc] ss:$16 sps:$4 sm:$0xff]  }
  0xd0   :  { %1587 = vmatprep.subr.bf16.mxu0 %v2982_v20  ;;  %v2943_v20 = vld [vmem:[#allocation5 + $0x44c] ss:$16 sps:$4 sm:$0xff]  }
  0xd1   :  { %1508 = vmatpush1.bf16.msra.mxu1 %v2887_v21  ;;  %v3019_v21 = vld [vmem:[#allocation7 + $0xb0] ss:$8 sps:$4 sm:$0xff]  }
  0xd2   :  { %1509 = vmatprep.subr.bf16.mxu1 %v2895_v22  ;;  %v3024_v22 = vld [vmem:[#allocation7 + $0xc4] ss:$8 sps:$4 sm:$0xff]  }
  0xd5   :  { %1510 = vmatpush1.bf16.msra.mxu1 %v2893_v24  ;;  %v2946_v24 = vld [vmem:[#allocation5 + $0x46c] ss:$16 sps:$4 sm:$0xff]  }
  0xd6   :  { %1511 = vmatprep.subr.bf16.mxu1 %v2898_v26  ;;  %v3027_v26 = vld [vmem:[#allocation7 + $0xd4] ss:$8 sps:$4 sm:$0xff]  }
  0xd9   :  { %2542 = vmatmul.mubr.msk.bf16.vlgmr.msra.gmra.mrb[0].mxu0 %vm1296_vm0, %v97_v29  ;;  %1512 = vmatpush1.bf16.msra.mxu1 %v2896_v27  ;;  %v2949_v27 = vld [vmem:[#allocation5 + $0x48c] ss:$16 sps:$4 sm:$0xff]  }
  0xda   :  { %1588 = vmatpush1.bf16.msra.mxu0 %v2980_v28  ;;  %1513 = vmatprep.subr.bf16.mxu1 %v2901_v8  ;;  %v2947_v28 = vld [vmem:[#allocation5 + $0x488] ss:$16 sps:$4 sm:$0xff]  }
  0xdb   :  { %1619 = vmatprep.mubr.bf16.mxu0 %v3228_v23  ;;  %2032 = vmatprep.subr.bf16.mxu0 %v2988_v37  ;;  %v2941_v23 = vld [vmem:[#allocation5 + $0x448] ss:$16 sps:$4 sm:$0xff]   ;;  %v3030_v37 = vld [vmem:[#allocation7 + $0xe4] ss:$8 sps:$4 sm:$0xff]  }
  0xdc   :  { %v2950_v8 = vld [vmem:[#allocation5 + $0x4a8] ss:$16 sps:$4 sm:$0xff]  }
  0xdd   :  { %1514 = vmatpush1.bf16.msra.mxu1 %v2899_v30  ;;  %v2955_v30 = vld [vmem:[#allocation5 + $0x4cc] ss:$16 sps:$4 sm:$0xff]  }
  0xde   :  { %1515 = vmatprep.subr.bf16.mxu1 %v2904_v31  ;;  %v2953_v31 = vld [vmem:[#allocation5 + $0x4c8] ss:$16 sps:$4 sm:$0xff]  }
  0xe1   :  { %2543 = vmatmul.mubr.msk.bf16.vlgmr.msra.gmra.mrb[4].mxu0 %vm1296_vm0, %v97_v29  ;;  %1516 = vmatpush1.bf16.msra.mxu1 %v2902_v32  ;;  %v2952_v29 = vld [vmem:[#allocation5 + $0x4ac] ss:$16 sps:$4 sm:$0xff]  }
  0xe2   :  { %1517 = vmatprep.subr.bf16.mxu1 %v2907_v52  ;;  %2033 = vmatpush1.bf16.msra.mxu0 %v2986_v36  ;;  %v2958_v32 = vld [vmem:[#allocation5 + $0x4ec] ss:$16 sps:$4 sm:$0xff]   ;;  %v2956_v52 = vld [vmem:[#allocation5 + $0x4e8] ss:$16 sps:$4 sm:$0xff]  }
  0xe3   :  { %2034 = vmatprep.subr.bf16.mxu0 %v2991_v38  ;;  %v2964_v36 = vld [vmem:[#allocation5 + $0x52c] ss:$16 sps:$4 sm:$0xff]   ;;  %v3028_v38 = vld [vmem:[#allocation7 + $0xe0] ss:$8 sps:$4 sm:$0xff]  }
  0xe5   :  { %1518 = vmatpush1.bf16.msra.mxu1 %v2905_v33  ;;  %v2961_v33 = vld [vmem:[#allocation5 + $0x50c] ss:$16 sps:$4 sm:$0xff]  }
  0xe6   :  { %1519 = vmatprep.subr.bf16.mxu1 %v2910_v34  ;;  %2035 = vmatpush1.bf16.msra.mxu0 %v2989_v40  ;;  %v2959_v34 = vld [vmem:[#allocation5 + $0x508] ss:$16 sps:$4 sm:$0xff]   ;;  %v2967_v40 = vld [vmem:[#allocation5 + $0x54c] ss:$16 sps:$4 sm:$0xff]  }
  0xe7   :  { %2036 = vmatprep.subr.bf16.mxu0 %v2994_v42  ;;  %v3031_v42 = vld [vmem:[#allocation7 + $0xf0] ss:$8 sps:$4 sm:$0xff]  }
  0xe9   :  { %1520 = vmatpush1.bf16.msra.mxu1 %v2908_v39  ;;  %v2962_v39 = vld [vmem:[#allocation5 + $0x528] ss:$16 sps:$4 sm:$0xff]  }
  0xea   :  { %1521 = vmatprep.subr.bf16.mxu1 %v2913_v41  ;;  %2037 = vmatpush1.bf16.msra.mxu0 %v2992_v44  ;;  %v3033_v41 = vld [vmem:[#allocation7 + $0xf4] ss:$8 sps:$4 sm:$0xff]  }
  0xeb   :  { %2038 = vmatprep.subr.bf16.mxu0 %v2997_v46  ;;  %v2970_v44 = vld [vmem:[#allocation5 + $0x56c] ss:$16 sps:$4 sm:$0xff]   ;;  %v2968_v46 = vld [vmem:[#allocation5 + $0x568] ss:$16 sps:$4 sm:$0xff]  }
  0xed   :  { %1522 = vmatpush1.bf16.msra.mxu1 %v2911_v43  ;;  %v2965_v43 = vld [vmem:[#allocation5 + $0x548] ss:$16 sps:$4 sm:$0xff]  }
  0xee   :  { %1523 = vmatprep.subr.bf16.mxu1 %v2916_v45  ;;  %2039 = vmatpush1.bf16.msra.mxu0 %v2995_v48  ;;  %v3036_v45 = vld [vmem:[#allocation7 + $0x104] ss:$8 sps:$4 sm:$0xff]   ;;  %v2971_v48 = vld [vmem:[#allocation5 + $0x588] ss:$16 sps:$4 sm:$0xff]  }
  0xef   :  { %2040 = vmatprep.subr.bf16.mxu0 %v3000_v50  ;;  %v2974_v50 = vld [vmem:[#allocation5 + $0x5a8] ss:$16 sps:$4 sm:$0xff]  }
  0xf1   :  { %1524 = vmatpush1.bf16.msra.mxu1 %v2914_v47  ;;  %v2973_v47 = vld [vmem:[#allocation5 + $0x58c] ss:$16 sps:$4 sm:$0xff]  }
  0xf2   :  { %1525 = vmatprep.subr.bf16.mxu1 %v2919_v49  ;;  %2041 = vmatpush1.bf16.msra.mxu0 %v2998_v53  ;;  %v2976_v49 = vld [vmem:[#allocation5 + $0x5ac] ss:$16 sps:$4 sm:$0xff]   ;;  %v2977_v53 = vld [vmem:[#allocation5 + $0x5c8] ss:$16 sps:$4 sm:$0xff]  }
  0xf3   :  { %2042 = vmatprep.subr.bf16.mxu0 %v3003_v55  ;;  %v2983_v55 = vld [vmem:[#allocation5 + $0x5e8] ss:$16 sps:$4 sm:$0xff]  }
  0xf5   :  { %1526 = vmatpush1.bf16.msra.mxu1 %v2917_v51  ;;  %v2979_v51 = vld [vmem:[#allocation5 + $0x5cc] ss:$16 sps:$4 sm:$0xff]  }
  0xf6   :  { %1527 = vmatprep.subr.bf16.mxu1 %v2922_v54  ;;  %2043 = vmatpush1.bf16.msra.mxu0 %v3001_v57  ;;  %v2985_v54 = vld [vmem:[#allocation5 + $0x5ec] ss:$16 sps:$4 sm:$0xff]  }
  0xf7   :  { %2044 = vmatprep.subr.bf16.mxu0 %v3006_v59 }
  0xf9   :  { %1528 = vmatpush1.bf16.msra.mxu1 %v2920_v56 }
  0xfa   :  { %1529 = vmatprep.subr.bf16.mxu1 %v2925_v58  ;;  %2045 = vmatpush1.bf16.msra.mxu0 %v3004_v61 }
  0xfb   :  { %2046 = vmatprep.subr.bf16.mxu0 %v3009_v63  ;;  %v3356_v63 = vld [vmem:[%s3402_s2] sm:$0xf] }
  0xfd   :  { %1530 = vmatpush1.bf16.msra.mxu1 %v2923_v60  ;;  %v296_v60 = vlaneseq }
  0xfe   :  { %1531 = vmatprep.subr.bf16.mxu1 %v2928_v62  ;;  %2047 = vmatpush1.bf16.msra.mxu0 %v3007_v1 }
  0xff   :  { %2048 = vmatprep.subr.bf16.mxu0 %v3012_v3  ;;  %v3350_v61 = vshrl.u32 %v296_v60, 7  ;;  %v3082_v3 = vld [vmem:[#allocation8 + $0x40] sm:$0xff]   ;;  %v3081_v60 = vld [vmem:[#allocation7 + $0x1f4] ss:$8 sps:$4 sm:$0xff]  }
 0x101   :  { %1532 = vmatpush1.bf16.msra.mxu1 %v2926_v0  ;;  %v298_v62 = vsub.s32 0, %v3350_v61  ;;  %v302_v0 = vsub.s32 1, %v3350_v61 }
 0x102   :  { %1533 = vmatprep.subr.bf16.mxu1 %v2931_v2  ;;  %2049 = vmatpush1.bf16.msra.mxu0 %v3010_v5  ;;  %v3084_v5 = vld [vmem:[#allocation8 + $0x48] sm:$0xff]  }
 0x103   :  { %2050 = vmatprep.subr.bf16.mxu0 %v3015_v7  ;;  %v303_v1 = vrot.slane %v3356_v63, %v302_v0 }
 0x105   :  { %1534 = vmatpush1.bf16.msra.mxu1 %v2929_v4  ;;  %v3083_v4 = vld [vmem:[#allocation8] sm:$0xff]  }
 0x106   :  { %1535 = vmatprep.subr.bf16.mxu1 %v2934_v6  ;;  %2051 = vmatpush1.bf16.msra.mxu0 %v3013_v10 }
 0x107   :  { %2052 = vmatprep.subr.bf16.mxu0 %v3018_v13 }
 0x109   :  { %1536 = vmatpush1.bf16.msra.mxu1 %v2932_v9 }
 0x10a   :  { %1546 = vmatprep.subr.bf16.mxu1 %v2937_v12  ;;  %2053 = vmatpush1.bf16.msra.mxu0 %v3016_v17 }
 0x10b   :  { %2054 = vmatprep.subr.bf16.mxu0 %v3021_v18  ;;  %v3086_v18 = vld [vmem:[#allocation8 + $0x50] sm:$0xff]  }
 0x10c   :  { %1538 = vmatmul.mubr.bf16.vlgmr.msra.gmra.mrb[4].mxu1 %v3334_v11  ;;  %v2944_v11 = vld [vmem:[#allocation5 + $0x468] ss:$16 sps:$4 sm:$0xff]  }
 0x10d   :  { %1547 = vmatpush1.bf16.msra.mxu1 %v2935_v14  ;;  %1578 = vmatprep.mubr.bf16.mxu1 %v3339_v35  ;;  %v3025_v35 = vld [vmem:[#allocation7 + $0xd0] ss:$8 sps:$4 sm:$0xff]   ;;  %v3085_v14 = vld [vmem:[#allocation8 + $0x8] sm:$0xff]  }
 0x10e   :  { %1548 = vmatprep.subr.bf16.mxu1 %v2940_v15  ;;  %2055 = vmatpush1.bf16.msra.mxu0 %v3019_v21  ;;  %v3034_v21 = vld [vmem:[#allocation7 + $0x100] ss:$8 sps:$4 sm:$0xff]  }
 0x10f   :  { %2056 = vmatprep.subr.bf16.mxu0 %v3024_v22  ;;  %v3087_v22 = vld [vmem:[#allocation8 + $0x10] sm:$0xff]  }
 0x111   :  { %1549 = vmatpush1.bf16.msra.mxu1 %v2938_v19 }
 0x112   :  { %1550 = vmatprep.subr.bf16.mxu1 %v2943_v20  ;;  %2057 = vmatpush1.bf16.msra.mxu0 %v3022_v25  ;;  %v3088_v25 = vld [vmem:[#allocation8 + $0x58] sm:$0xff]  }
 0x113   :  { %2058 = vmatprep.subr.bf16.mxu0 %v3027_v26 }
 0x115   :  { %1551 = vmatpush1.bf16.msra.mxu1 %v2941_v23 }
 0x116   :  { %1552 = vmatprep.subr.bf16.mxu1 %v2946_v24  ;;  %2059 = vmatpush1.bf16.msra.mxu0 %v3025_v35  ;;  %v3039_v24 = vld [vmem:[#allocation7 + $0x114] ss:$8 sps:$4 sm:$0xff]  }
 0x117   :  { %2060 = vmatprep.subr.bf16.mxu0 %v3030_v37  ;;  %v3048_v37 = vld [vmem:[#allocation7 + $0x144] ss:$8 sps:$4 sm:$0xff]  }
 0x119   :  { %1553 = vmatpush1.bf16.msra.mxu1 %v2944_v11 }
 0x11a   :  { %1554 = vmatprep.subr.bf16.mxu1 %v2949_v27  ;;  %2061 = vmatpush1.bf16.msra.mxu0 %v3028_v38  ;;  %v3037_v27 = vld [vmem:[#allocation7 + $0x110] ss:$8 sps:$4 sm:$0xff]   ;;  %v3046_v38 = vld [vmem:[#allocation7 + $0x140] ss:$8 sps:$4 sm:$0xff]  }
 0x11b   :  { %2062 = vmatprep.subr.bf16.mxu0 %v3033_v41  ;;  %v3054_v41 = vld [vmem:[#allocation7 + $0x164] ss:$8 sps:$4 sm:$0xff]  }
 0x11d   :  { %1555 = vmatpush1.bf16.msra.mxu1 %v2947_v28  ;;  %v3089_v28 = vld [vmem:[#allocation8 + $0x18] sm:$0xff]  }
 0x11e   :  { %1556 = vmatprep.subr.bf16.mxu1 %v2952_v29  ;;  %2063 = vmatpush1.bf16.msra.mxu0 %v3031_v42  ;;  %v3042_v29 = vld [vmem:[#allocation7 + $0x124] ss:$8 sps:$4 sm:$0xff]   ;;  %v3052_v42 = vld [vmem:[#allocation7 + $0x160] ss:$8 sps:$4 sm:$0xff]  }
 0x11f   :  { %2073 = vmatprep.subr.bf16.mxu0 %v3036_v45  ;;  %v3060_v45 = vld [vmem:[#allocation7 + $0x184] ss:$8 sps:$4 sm:$0xff]  }
 0x121   :  { %1557 = vmatpush1.bf16.msra.mxu1 %v2950_v8 }
 0x122   :  { %1558 = vmatprep.subr.bf16.mxu1 %v2955_v30  ;;  %v3090_v30 = vld [vmem:[#allocation8 + $0x60] sm:$0xff]  }
 0x125   :  { %1559 = vmatpush1.bf16.msra.mxu1 %v2953_v31  ;;  %v3040_v31 = vld [vmem:[#allocation7 + $0x120] ss:$8 sps:$4 sm:$0xff]  }
 0x126   :  { %1560 = vmatprep.subr.bf16.mxu1 %v2958_v32  ;;  %v3091_v32 = vld [vmem:[#allocation8 + $0x20] sm:$0xff]  }
 0x129   :  { %1561 = vmatpush1.bf16.msra.mxu1 %v2956_v52  ;;  %v3045_v52 = vld [vmem:[#allocation7 + $0x134] ss:$8 sps:$4 sm:$0xff]  }
 0x12a   :  { %1562 = vmatprep.subr.bf16.mxu1 %v2961_v33  ;;  %v3092_v33 = vld [vmem:[#allocation8 + $0x68] sm:$0xff]  }
 0x12d   :  { %1563 = vmatpush1.bf16.msra.mxu1 %v2959_v34  ;;  %v3043_v34 = vld [vmem:[#allocation7 + $0x130] ss:$8 sps:$4 sm:$0xff]  }
 0x12e   :  { %1564 = vmatprep.subr.bf16.mxu1 %v2964_v36  ;;  %v3093_v36 = vld [vmem:[#allocation8 + $0x28] sm:$0xff]  }
 0x131   :  { %1565 = vmatpush1.bf16.msra.mxu1 %v2962_v39  ;;  %v3051_v39 = vld [vmem:[#allocation7 + $0x154] ss:$8 sps:$4 sm:$0xff]  }
 0x132   :  { %1566 = vmatprep.subr.bf16.mxu1 %v2967_v40  ;;  %v3049_v40 = vld [vmem:[#allocation7 + $0x150] ss:$8 sps:$4 sm:$0xff]  }
 0x135   :  { %1567 = vmatpush1.bf16.msra.mxu1 %v2965_v43  ;;  %v3057_v43 = vld [vmem:[#allocation7 + $0x174] ss:$8 sps:$4 sm:$0xff]  }
 0x136   :  { %1568 = vmatprep.subr.bf16.mxu1 %v2970_v44  ;;  %v3055_v44 = vld [vmem:[#allocation7 + $0x170] ss:$8 sps:$4 sm:$0xff]  }
 0x139   :  { %1569 = vmatpush1.bf16.msra.mxu1 %v2968_v46  ;;  %v3058_v46 = vld [vmem:[#allocation7 + $0x180] ss:$8 sps:$4 sm:$0xff]  }
 0x13a   :  { %1570 = vmatprep.subr.bf16.mxu1 %v2973_v47  ;;  %v3063_v47 = vld [vmem:[#allocation7 + $0x194] ss:$8 sps:$4 sm:$0xff]  }
 0x13d   :  { %1571 = vmatpush1.bf16.msra.mxu1 %v2971_v48  ;;  %v3061_v48 = vld [vmem:[#allocation7 + $0x190] ss:$8 sps:$4 sm:$0xff]  }
 0x13e   :  { %1572 = vmatprep.subr.bf16.mxu1 %v2976_v49  ;;  %v3066_v49 = vld [vmem:[#allocation7 + $0x1a4] ss:$8 sps:$4 sm:$0xff]  }
 0x141   :  { %1573 = vmatpush1.bf16.msra.mxu1 %v2974_v50  ;;  %v3064_v50 = vld [vmem:[#allocation7 + $0x1a0] ss:$8 sps:$4 sm:$0xff]  }
 0x142   :  { %1574 = vmatprep.subr.bf16.mxu1 %v2979_v51  ;;  %v3069_v51 = vld [vmem:[#allocation7 + $0x1b4] ss:$8 sps:$4 sm:$0xff]  }
 0x145   :  { %1575 = vmatpush1.bf16.msra.mxu1 %v2977_v53  ;;  %v3067_v53 = vld [vmem:[#allocation7 + $0x1b0] ss:$8 sps:$4 sm:$0xff]  }
 0x146   :  { %1576 = vmatprep.subr.bf16.mxu1 %v2985_v54  ;;  %v3072_v54 = vld [vmem:[#allocation7 + $0x1c4] ss:$8 sps:$4 sm:$0xff]  }
 0x149   :  { %1577 = vmatpush1.bf16.msra.mxu1 %v2983_v55  ;;  %v3070_v55 = vld [vmem:[#allocation7 + $0x1c0] ss:$8 sps:$4 sm:$0xff]  }
 0x14a   :  { %2625 = vmatprep.subr.bf16.mxu1 %v3082_v3 }
 0x14c   :  { %1579 = vmatmul.mubr.bf16.vlgmr.msra.gmra.mrb[4].mxu1 %v3342_v16  ;;  %v299_v16 = vrot.slane %v3356_v63, %v298_v62 }
 0x14d   :  { %2626 = vmatpush3.bf16.msra.mxu1 %v3083_v4 }
 0x14e   :  { %2627 = vmatprep.subr.bf16.mxu1 %v3084_v5 }
 0x151   :  { %2628 = vmatpush3.bf16.msra.mxu1 %v3085_v14 }
 0x152   :  { %2629 = vmatprep.subr.bf16.mxu1 %v3086_v18 }
 0x155   :  { %2630 = vmatpush3.bf16.msra.mxu1 %v3087_v22  ;;  %v3097_v22 = vld [vmem:[#allocation8 + $0x38] sm:$0xff]  }
 0x156   :  { %2631 = vmatprep.subr.bf16.mxu1 %v3088_v25 }
 0x159   :  { %2632 = vmatpush3.bf16.msra.mxu1 %v3089_v28 }
 0x15a   :  { %2633 = vmatprep.subr.bf16.mxu1 %v3090_v30 }
 0x15d   :  { %2634 = vmatpush3.bf16.msra.mxu1 %v3091_v32 }
 0x15e   :  { %2635 = vmatprep.subr.bf16.mxu1 %v3092_v33 }
 0x15f   :  { %v1334_v56 = vpop.f32.mrb[0].mxu1 }
 0x160   :  { %v1336_v57 = vpop.f32.mrb[1].mxu1  ;;  %v1335_v2 = vadd.f32 %v1334_v56, %v299_v16  ;;  %v3075_v56 = vld [vmem:[#allocation7 + $0x1d4] ss:$8 sps:$4 sm:$0xff]   ;;  %v3079_v16 = vld [vmem:[#allocation7 + $0x1f0] ss:$8 sps:$4 sm:$0xff]  }
 0x161   :  { %v1338_v58 = vpop.f32.mrb[2].mxu1  ;;  %v1337_v6 = vadd.f32 %v1336_v57, %v303_v1  ;;  %2636 = vmatpush3.bf16.msra.mxu1 %v3093_v36  ;;  %v3073_v57 = vld [vmem:[#allocation7 + $0x1d0] ss:$8 sps:$4 sm:$0xff]   ;;  %v306_v1 = vsub.s32 2, %v3350_v61 }
 0x162   :  { %v1339_v59 = vpop.f32.mrb[3].mxu1  ;;  %v3078_v58 = vld [vmem:[#allocation7 + $0x1e4] ss:$8 sps:$4 sm:$0xff]  }
 0x163   :  { %v3076_v59 = vld [vmem:[#allocation7 + $0x1e0] ss:$8 sps:$4 sm:$0xff]   ;;  %v307_v3 = vrot.slane %v3356_v63, %v306_v1 }
 0x1ac   :  { %v1457_v7 = vpop.f32.mrb[0].mxu0 }
 0x1ad   :  { %v2648_v9 = vadd.f32 %v1457_v7, %v1335_v2  ;;  %v1459_v10 = vpop.f32.mrb[1].mxu0  ;;  %v310_v2 = vsub.s32 3, %v3350_v61 }
 0x1ae   :  { %v2650_v12 = vadd.f32 %v1459_v10, %v1337_v6  ;;  %v1461_v13 = vpop.f32.mrb[2].mxu0 }
 0x1af   :  { %v1628_v15 = vmax.f32 %v2648_v9, 0.0  ;;  %v1462_v17 = vpop.f32.mrb[3].mxu0  ;;  %v311_v4 = vrot.slane %v3356_v63, %v310_v2  ;;  %v3096_v63 = vld [vmem:[#allocation8 + $0x78] sm:$0xff]  }
 0x1b0   :  { %v1629_v19 = vmax.f32 %v2650_v12, 0.0 }
 0x1b1   :  { %v1632_v23 = vpack.c.bf16 %v1628_v15, %v1628_v15 }
 0x1b2   :  { %v1633_v20 = vpack.c.bf16 %v1629_v19, %v1629_v19 }
 0x1b4   :  { %2064 = vmatprep.mubr.bf16.mxu0 %v1633_v20  ;;  %v3365_v26 = vpop.f32.mrb[4].mxu0  ;;  %v3094_v20 = vld [vmem:[#allocation8 + $0x70] sm:$0xff]  }
 0x1b5   :  { %2065 = vmatmul.mubr.bf16.vlgmr.msra.gmra.mrb[8].mxu0 %v1632_v23  ;;  %v3367_v11 = vpop.f32.mrb[5].mxu0  ;;  %2637 = vmatprep.subr.bf16.mxu1 %v3094_v20  ;;  %v2297_v23 = vld [vmem:[%s3407_s7] sm:$0xff] }
 0x1b6   :  { %2074 = vmatpush1.bf16.msra.mxu0 %v3034_v21  ;;  %v1625_v35 = vpop.f32.mrb[6].mxu0  ;;  %v3095_v21 = vld [vmem:[#allocation8 + $0x30] sm:$0xff]   ;;  %2299 = vrot.lane.b32.xlu1 %v2297_v23, %s3229_s13 }
 0x1b7   :  { %2075 = vmatprep.subr.bf16.mxu0 %v3039_v24  ;;  %v1626_v8 = vpop.f32.mrb[7].mxu0  ;;  %2638 = vmatpush3.bf16.msra.mxu1 %v3095_v21  ;;  %v1700_v24 = vld [vmem:[%s3404_s4] sm:$0x3] }
 0x1b8   :  { %2639 = vmatprep.subr.bf16.mxu1 %v3096_v63  ;;  %v1705_v25 = vrot.slane %v1700_v24, %v298_v62  ;;  %v2608_v62 = vld [vmem:[%s3406_s6] ss:$0 sm:$0xff]  ;;  %s3231_s6 = smov 126  }
 0x1ba   :  { %2076 = vmatpush1.bf16.msra.mxu0 %v3037_v27 }
 0x1bb   :  { %2077 = vmatprep.subr.bf16.mxu0 %v3042_v29  ;;  %2640 = vmatpush3.bf16.msra.mxu1 %v3097_v22 }
 0x1be   :  { %2078 = vmatpush1.bf16.msra.mxu0 %v3040_v31 }
 0x1bf   :  { %2079 = vmatprep.subr.bf16.mxu0 %v3045_v52 }
 0x1c2   :  { %2080 = vmatpush1.bf16.msra.mxu0 %v3043_v34 }
 0x1c3   :  { %2081 = vmatprep.subr.bf16.mxu0 %v3048_v37 }
 0x1c6   :  { %2082 = vmatpush1.bf16.msra.mxu0 %v3046_v38 }
 0x1c7   :  { %2083 = vmatprep.subr.bf16.mxu0 %v3051_v39 }
 0x1ca   :  { %2084 = vmatpush1.bf16.msra.mxu0 %v3049_v40 }
 0x1cb   :  { %2085 = vmatprep.subr.bf16.mxu0 %v3054_v41  ;;  %v3230_v41 = vmov 0.0  }
 0x1cc   :  { %2325 = vst [vmem:[#allocation10] sm:$0xff] %v3230_v41 }
 0x1ce   :  { %2086 = vmatpush1.bf16.msra.mxu0 %v3052_v42 }
 0x1cf   :  { %2087 = vmatprep.subr.bf16.mxu0 %v3057_v43 }
 0x1d2   :  { %2088 = vmatpush1.bf16.msra.mxu0 %v3055_v44 }
 0x1d3   :  { %2089 = vmatprep.subr.bf16.mxu0 %v3060_v45 }
 0x1d6   :  { %2090 = vmatpush1.bf16.msra.mxu0 %v3058_v46 }
 0x1d7   :  { %2091 = vmatprep.subr.bf16.mxu0 %v3063_v47 }
 0x1da   :  { %2092 = vmatpush1.bf16.msra.mxu0 %v3061_v48 }
 0x1db   :  { %2093 = vmatprep.subr.bf16.mxu0 %v3066_v49 }
 0x1de   :  { %2094 = vmatpush1.bf16.msra.mxu0 %v3064_v50 }
 0x1df   :  { %2095 = vmatprep.subr.bf16.mxu0 %v3069_v51 }
 0x1e2   :  { %2096 = vmatpush1.bf16.msra.mxu0 %v3067_v53 }
 0x1e3   :  { %2097 = vmatprep.subr.bf16.mxu0 %v3072_v54 }
 0x1e6   :  { %2098 = vmatpush1.bf16.msra.mxu0 %v3070_v55 }
 0x1e7   :  { %2099 = vmatprep.subr.bf16.mxu0 %v3075_v56 }
 0x1ea   :  { %2100 = vmatpush1.bf16.msra.mxu0 %v3073_v57 }
 0x1eb   :  { %2101 = vmatprep.subr.bf16.mxu0 %v3078_v58 }
 0x1ee   :  { %2102 = vmatpush1.bf16.msra.mxu0 %v3076_v59 }
 0x1ef   :  { %2103 = vmatprep.subr.bf16.mxu0 %v3081_v60 }
 0x1f2   :  { %2104 = vmatpush1.bf16.msra.mxu0 %v3079_v16 }
 0x21f   :  { %v1580_v5 = vpop.f32.mrb[4].mxu1 }
 0x220   :  { %v2651_v6 = vadd.f32 %v1580_v5, %v307_v3  ;;  %v1582_v7 = vpop.f32.mrb[5].mxu1 }
 0x221   :  { %v2653_v9 = vadd.f32 %v1582_v7, %v311_v4  ;;  %v1584_v10 = vpop.f32.mrb[6].mxu1 }
 0x222   :  { %v2652_v12 = vadd.f32 %v2651_v6, %v3365_v26  ;;  %v1585_v13 = vpop.f32.mrb[7].mxu1  ;;  %v1709_v26 = vrot.slane %v1700_v24, %v302_v0 }
 0x223   :  { %v2654_v14 = vadd.f32 %v2653_v9, %v3367_v11 }
 0x224   :  { %v1630_v15 = vmax.f32 %v2652_v12, 0.0 }
 0x225   :  { %v1631_v17 = vmax.f32 %v2654_v14, 0.0 }
 0x226   :  { %v1634_v19 = vpack.c.bf16 %v1630_v15, %v1630_v15 }
 0x227   :  { %v1635_v18 = vpack.c.bf16 %v1631_v17, %v1631_v17 }
 0x228   :  { %v2300_v48 = vpop.permute.xlu1 %2299 }
 0x229   :  { %2105 = vmatprep.mubr.bf16.mxu0 %v1635_v18 }
 0x22a   :  { %2106 = vmatmul.mubr.bf16.vlgmr.msra.gmra.mrb[8].mxu0 %v1634_v19 }
 0x2fd   :  { %v2107_v11 = vpop.f32.mrb[8].mxu0 }
 0x2fe   :  { %v2655_v27 = vadd.f32 %v2107_v11, %v1705_v25  ;;  %v2109_v35 = vpop.f32.mrb[9].mxu0 }
 0x2ff   :  { %v2656_v28 = vadd.f32 %v2109_v35, %v1709_v26  ;;  %v2111_v29 = vpop.f32.mrb[10].mxu0 }
 0x300   :  { %v2114_v8 = vmax.f32 %v2655_v27, 0.0  ;;  %v2112_v30 = vpop.f32.mrb[11].mxu0 }
 0x301   :  { %v2115_v31 = vmax.f32 %v2656_v28, 0.0 }
 0x302   :  { %v2116_v52 = vpack.c.bf16 %v2114_v8, %v2114_v8 }
 0x303   :  { %v2117_v32 = vpack.c.bf16 %v2115_v31, %v2115_v31 }
 0x305   :  { %2285 = vmatprep.mubr.bf16.mxu1 %v2117_v32 }
 0x306   :  { %2286 = vmatmul.mubr.bf16.vlgmr.msra.gmra.mrb[8].mxu1 %v2116_v52 }
 0x3d9   :  { %v2641_v33 = vpop.f32.mrb[8].mxu1 }
 0x3da   :  { %v2642_v34 = vpop.f32.mrb[9].mxu1 }
 0x3db   :  { %v2643_v61 = vadd.f32 %v2642_v34, %v2641_v33  ;;  %v2644_v0 = vpop.f32.mrb[10].mxu1 }
 0x3dc   :  { %v2645_v36 = vpop.f32.mrb[11].mxu1 }
 0x3dd   :  { %v2288_v37 = vadd.f32 %v2643_v61, %v2608_v62 }
 0x3df   :  { %v2309_v38 = vmul.f32 %v2288_v37, %v2288_v37  ;;  %v2293_v39 = vmul.f32 1.442695, %v2288_v37  ;;  %v2296_v40 = vmul.f32 2.0, %v2288_v37 }
 0x3e1   :  { %2311 = vrot.lane.b32.xlu0 %v2309_v38, %s3229_s13  ;;  %3098 = vpow2.f32 %v2293_v39  ;;  %v2308_v43 = vadd.f32 1.0, %v2296_v40 }
 0x3eb   :  { %v3099_v42 = vpop.eup %3098 }
 0x3ec   :  { %v2295_v45 = vmul.f32 %v3099_v42, %v3099_v42  ;;  %v2302_v49 = vmul.f32 %v3099_v42, %v2300_v48 }
 0x453   :  { %v2312_v44 = vpop.permute.xlu0 %2311 }
 0x454   :  { %v2314_v46 = vsub.f32 %v2308_v43, %v2312_v44 }
 0x456   :  { %v2315_v47 = vsub.f32 %v2314_v46, %v2295_v45 }
 0x458   :  { %2317 = vrot.lane.b32.xlu0 %v2315_v47, %s3231_s6 }
 0x45c   :  { %2304 = vrot.lane.b32.xlu0 %v2302_v49, %s3231_s6 }
 0x4ca   :  { %v2318_v50 = vpop.permute.xlu0 %2317 }
 0x4cb   :  { %v2321_v51 = vsel %vm2320_vm1, %v2318_v50, 0.0 }
 0x4cc   :  { %2322 = vadd.xlane.f32.xlu1 %v2321_v51 }
 0x4ce   :  { %v2305_v53 = vpop.permute.xlu0 %2304 }
 0x4cf   :  { %v2307_v54 = vadd.f32 %v2305_v53, %v2288_v37 }
 0x4d1   :  { %2326 = vst.msk [vmem:[#allocation10] sm:$0xff] %vm2320_vm1, %v2307_v54 }
 0x559   :  { %v2323_v55 = vpop.xlane.xlu1 %2322 }
 0x55a   :  { %v2324_v56 = vmul.f32 -0.5, %v2323_v55 }
 0x55c   :  { %2328 = vst.msk [vmem:[#allocation10] sm:$0xff] %vm2327_vm2, %v2324_v56 }
 0x55d   :  { %3199 = shalt.err (!%p3196_p8)
}
 0x55e   :  { %s3200_s20 = scalar_lea.hbm %s3408_s8, 128 }
 0x55f   :  { %p3201_p9 = scmp.ne.s32.totalorder %s3408_s8, %s3200_s20  ;;  %p3204_p10 = scmp.lt.u32.totalorder %s3200_s20, %s3408_s8 }
 0x561   :  { %p3206_p11 = pnand %p3204_p10, %p3201_p9 }
 0x563   :  { %3209 = shalt.err (!%p3206_p11)
}
 0x564   :  { %2338 = dma.vmem_to_hbm [thread:$0]  %s2336_s17, 128, %s3408_s8, [#allocation4]  }
 0x565   :  { %3216 = dma.done.wait [#allocation4], 128  }
 0x566   :  { %3217 = vsyncadd [#allocation4], 4294967168 }
 0x567   :  { %2342 = vsyncpa [#allocation3], 1 }
 0x568   :  { %2343 = vsyncpa [#allocation6], 1 }
 0x569   :  { %2344 = vsyncpa [#allocation9], 1 }
 0x56a   :  { %2345 = vsyncpa [#allocation4], 1 }

</bundles_post_ra>
